<compile_context>
chip_gen: v5e
topology: v5e:2x2
jax: 0.10.0
libtpu: 0.0.40
codegen_flags: <defaults>
</compile_context>

<pallas_src>
from functools import partial

import jax
import jax.numpy as jnp
from jax.experimental import pallas as pl
from jax.experimental.pallas import tpu as pltpu


def _pad_to(n, m):
    return ((n + m - 1) // m) * m


def _make_streaming_kernel(T_actual, TC, needs_tail_guard):
    """Kernel closure over static time-chunk parameters."""

    def kernel(xs_ref, hinit_ref, w1x_ref, wstk_ref, b_ref, wf_ref, bf_ref,
               logp_ref, hout_ref):
        c = pl.program_id(1)  # time-chunk index (innermost, "arbitrary")

        # Load the initial hidden state into the resident output block once
        # per batch tile.
        @pl.when(c == 0)
        def _():
            hout_ref[...] = hinit_ref[...]

        def step(s):
            x = xs_ref[s]            # [TB, D]
            h0 = hout_ref[0]         # [TB, H] carried across chunks (resident)
            h1 = hout_ref[1]
            h2 = hout_ref[2]

            # rnnsfc1: relu(cat([x, h0]) @ W1.T + b1)   (exact split form)
            nh0 = jnp.maximum(
                jnp.dot(x, w1x_ref[...], preferred_element_type=jnp.float32)
                + jnp.dot(h0, wstk_ref[0], preferred_element_type=jnp.float32)
                + b_ref[0],
                0.0,
            )
            # dropout1: identity (eval mode)

            # rnnsfc2: relu(cat([nh0, h1]) @ W2.T + b2)
            nh1 = jnp.maximum(
                jnp.dot(nh0, wstk_ref[1], preferred_element_type=jnp.float32)
                + jnp.dot(h1, wstk_ref[2], preferred_element_type=jnp.float32)
                + b_ref[1],
                0.0,
            )
            # dropout2: identity

            # rnnsfc3: relu(cat([nh1, h2]) @ W3.T + b3)
            nh2 = jnp.maximum(
                jnp.dot(nh1, wstk_ref[3], preferred_element_type=jnp.float32)
                + jnp.dot(h2, wstk_ref[4], preferred_element_type=jnp.float32)
                + b_ref[2],
                0.0,
            )
            # dropout3: identity; flatten is a no-op on 2-D; relu(nh2) == nh2.

            logits = (jnp.dot(nh2, wf_ref[...], preferred_element_type=jnp.float32)
                      + bf_ref[...])

            # log_softmax (max-shifted).  Padded output lanes carry a -1e30
            # bias so their exp underflows to exactly 0.
            m = jnp.max(logits, axis=-1, keepdims=True)
            sft = logits - m
            lse = jnp.log(jnp.sum(jnp.exp(sft), axis=-1, keepdims=True))
            logp_ref[s] = sft - lse

            # carry the new hidden state (detach is a no-op for inference)
            hout_ref[0] = nh0
            hout_ref[1] = nh1
            hout_ref[2] = nh2

        # Statically unrolled inner time loop over the chunk.
        for s in range(TC):
            if needs_tail_guard:
                pl.when(c * TC + s < T_actual)(partial(step, s))
            else:
                step(s)

    return kernel


def streaming_sight_mu_scan(xs, h, params, *, time_chunk=8, batch_tile=None):
    """Run T module-forward steps in one pallas_call.

    xs: [T, batch, input_dim] (one module forward per t, recurrent in h)
    h : list of 3 arrays [batch, hidden]
    returns (logp [T, batch, output_dim], new h list of [batch, hidden])
    """
    T, batch, input_dim = xs.shape
    hidden = params["w1h"].shape[0]
    output_dim = params["wf"].shape[1]

    LANE, SUB = 128, 8
    B = _pad_to(batch, SUB)            # sublane-pad the batch
    D = _pad_to(input_dim, LANE)       # lane-pad the feature dims
    H = _pad_to(hidden, LANE)
    O = _pad_to(output_dim, LANE)

    TC = max(1, min(time_chunk, T))
    Tp = _pad_to(T, TC)
    needs_tail_guard = (Tp != T)

    TB = batch_tile if batch_tile is not None else B
    assert TB % SUB == 0 and B % TB == 0, "batch_tile must be a multiple of 8 dividing padded batch"

    f32 = jnp.float32

    # ---- pad & pack operands (all padding is with exact zeros, except the fc
    # bias, whose padded lanes get -1e30 so they vanish in log_softmax). ----
    xs_p = jnp.zeros((Tp, B, D), f32).at[:T, :batch, :input_dim].set(xs.astype(f32))

    hstack = jnp.zeros((3, B, H), f32)
    for i, hh in enumerate(h):
        hstack = hstack.at[i, :batch, :hidden].set(hh.astype(f32))

    def padw(w, rows, cols):
        w = jnp.asarray(w, f32)
        return jnp.zeros((rows, cols), f32).at[:w.shape[0], :w.shape[1]].set(w)

    w1x = padw(params["w1x"], D, H)
    wstack = jnp.stack([padw(params["w1h"], H, H), padw(params["w2a"], H, H),
                        padw(params["w2h"], H, H), padw(params["w3a"], H, H),
                        padw(params["w3h"], H, H)], axis=0)               # [5,H,H]
    bstack = jnp.stack([padw(params["b1"].reshape(1, -1), 1, H),
                        padw(params["b2"].reshape(1, -1), 1, H),
                        padw(params["b3"].reshape(1, -1), 1, H)], axis=0)  # [3,1,H]
    wf = padw(params["wf"], H, O)
    bf = jnp.full((1, O), -1e30, f32).at[:, :output_dim].set(
        jnp.asarray(params["bf"], f32).reshape(1, -1))

    def const_spec(shape):
        # Constant block index across the whole grid => fetched once, resident.
        return pl.BlockSpec(shape, lambda b, c: (0,) * len(shape))

    in_specs = [
        pl.BlockSpec((TC, TB, D), lambda b, c: (c, b, 0)),   # xs chunk
        pl.BlockSpec((3, TB, H), lambda b, c: (0, b, 0)),    # initial h (per batch tile)
        const_spec((D, H)),                                  # w1x
        const_spec((5, H, H)),                               # [w1h,w2a,w2h,w3a,w3h]
        const_spec((3, 1, H)),                               # [b1,b2,b3]
        const_spec((H, O)),                                  # wf
        const_spec((1, O)),                                  # bf
    ]
    out_specs = (
        pl.BlockSpec((TC, TB, O), lambda b, c: (c, b, 0)),   # per-chunk logp slab
        pl.BlockSpec((3, TB, H), lambda b, c: (0, b, 0)),    # resident carried h
    )
    out_shape = (
        jax.ShapeDtypeStruct((Tp, B, O), f32),
        jax.ShapeDtypeStruct((3, B, H), f32),
    )

    flops = 2 * Tp * B * (D * H + 5 * H * H + H * O)
    transcendentals = Tp * B * (O + 1)
    bytes_accessed = 4 * (
        Tp * B * D + 3 * B * H
        + D * H + 5 * H * H + 3 * H + H * O + O
        + Tp * B * O + 3 * B * H
    )

    fn = pl.pallas_call(
        _make_streaming_kernel(T, TC, needs_tail_guard),
        out_shape=out_shape,
        grid=(B // TB, Tp // TC),
        in_specs=in_specs,
        out_specs=out_specs,
        # Donate the packed initial-h buffer to the new-h output.
        input_output_aliases={1: 1},
        compiler_params=pltpu.CompilerParams(
            dimension_semantics=("parallel", "arbitrary")),
        cost_estimate=pl.CostEstimate(
            flops=flops, transcendentals=transcendentals,
            bytes_accessed=bytes_accessed),
    )
    logp, hout = fn(xs_p, hstack, w1x, wstack, bstack, wf, bf)

    logp = logp[:T, :batch, :output_dim]
    hnew = [hout[0, :batch, :hidden], hout[1, :batch, :hidden], hout[2, :batch, :hidden]]
    return logp, hnew


def streaming_sight_mu_forward(x, h, params):
    """Single-step call matching the PyTorch module signature.

    x: [batch, seq=1, input_dim]; h: list of 3 arrays [batch, hidden].
    """
    batch, seq_length, input_dim = x.shape
    assert seq_length == 1, "squeeze(1) in the reference requires seq_length == 1"
    xs = x.reshape(1, batch, input_dim)   # squeeze(1) + leading time axis of 1
    logp, hnew = streaming_sight_mu_scan(xs, h, params, time_chunk=1)
    return logp[0], hnew


# ---------------------------- pure-JAX reference ----------------------------

def _reference_step(x2d, h, params):
    """Pure-JAX reference mirroring one PyTorch forward (eval mode)."""
    hp = jax.lax.Precision.HIGHEST
    nh0 = jax.nn.relu(jnp.dot(x2d, params["w1x"], precision=hp)
                      + jnp.dot(h[0], params["w1h"], precision=hp) + params["b1"])
    nh1 = jax.nn.relu(jnp.dot(nh0, params["w2a"], precision=hp)
                      + jnp.dot(h[1], params["w2h"], precision=hp) + params["b2"])
    nh2 = jax.nn.relu(jnp.dot(nh1, params["w3a"], precision=hp)
                      + jnp.dot(h[2], params["w3h"], precision=hp) + params["b3"])
    logits = jnp.dot(jax.nn.relu(nh2), params["wf"], precision=hp) + params["bf"]
    return jax.nn.log_softmax(logits, axis=-1), [nh0, nh1, nh2]


def _reference_scan(xs, h, params):
    logps = []
    for t in range(xs.shape[0]):
        lp, h = _reference_step(xs[t], h, params)
        logps.append(lp)
    return jnp.stack(logps, axis=0), h


def init_params(key, input_dim, hidden, output_dim):
    """Deterministic synthetic init (PyTorch-style uniform(-1/sqrt(fan_in), ...))."""
    ks = jax.random.split(key, 8)

    def u(k, shape, fan_in):
        bound = 1.0 / jnp.sqrt(jnp.float32(fan_in))
        return jax.random.uniform(k, shape, jnp.float32, -bound, bound)

    fan1 = input_dim + hidden
    fan2 = hidden + hidden
    return {
        # rnnsfc1: Linear(input_dim + hidden -> hidden), weight split into x/h parts
        "w1x": u(ks[0], (input_dim, hidden), fan1),
        "w1h": u(ks[1], (hidden, hidden), fan1),
        "b1": u(ks[2], (1, hidden), fan1),
        # rnnsfc2: Linear(hidden + hidden -> hidden)
        "w2a": u(ks[3], (hidden, hidden), fan2),
        "w2h": u(ks[4], (hidden, hidden), fan2),
        "b2": u(ks[5], (1, hidden), fan2),
        # rnnsfc3: Linear(hidden + hidden -> hidden)
        "w3a": u(ks[6], (hidden, hidden), fan2),
        "w3h": u(ks[7], (hidden, hidden), fan2),
        "b3": u(jax.random.fold_in(key, 100), (1, hidden), fan2),
        # fc: Linear(hidden -> output_dim)
        "wf": u(jax.random.fold_in(key, 101), (hidden, output_dim), hidden),
        "bf": u(jax.random.fold_in(key, 102), (1, output_dim), hidden),
    }


if __name__ == "__main__":
    batch, T, input_dim, hidden, output_dim = 4, 10, 24, 32, 16

    key = jax.random.PRNGKey(0)
    k_x, k_h0, k_h1, k_h2, k_p = jax.random.split(key, 5)

    xs = jax.random.normal(k_x, (T, batch, input_dim), jnp.float32)
    h = [
        jax.random.normal(k_h0, (batch, hidden), jnp.float32),
        jax.random.normal(k_h1, (batch, hidden), jnp.float32),
        jax.random.normal(k_h2, (batch, hidden), jnp.float32),
    ]
    params = init_params(k_p, input_dim, hidden, output_dim)

    # Streaming run: T module-forward steps, time-chunked (TC=4 -> tail guard
    # path exercised since 4 does not divide 10 evenly... it does not: Tp=12).
    logp, hnew = streaming_sight_mu_scan(xs, h, params, time_chunk=4)
    jax.block_until_ready(logp)
    for hh in hnew:
        jax.block_until_ready(hh)

    logp_ref, h_ref = _reference_scan(xs, h, params)
    assert jnp.allclose(logp, logp_ref, atol=1e-3, rtol=1e-3), (
        float(jnp.max(jnp.abs(logp - logp_ref))))
    for a, b in zip(hnew, h_ref):
        assert jnp.allclose(a, b, atol=1e-3, rtol=1e-3)

    # Single-step call matching the original PyTorch forward signature.
    x1 = xs[0][:, None, :]                     # [batch, 1, input_dim]
    logp1, h1new = streaming_sight_mu_forward(x1, h, params)
    jax.block_until_ready(logp1)
    logp1_ref, h1_ref = _reference_step(xs[0], h, params)
    assert jnp.allclose(logp1, logp1_ref, atol=1e-3, rtol=1e-3)
    for a, b in zip(h1new, h1_ref):
        assert jnp.allclose(a, b, atol=1e-3, rtol=1e-3)

    print("KERNEL_OK")
</pallas_src>

<mosaic_0001>
module attributes {stable_mosaic.version = 11 : i64} {
  func.func @kernel(%arg0: i32, %arg1: i32, %arg2: memref<4x8x128xf32, #tpu.memory_space<vmem>>, %arg3: memref<3x8x128xf32, #tpu.memory_space<vmem>>, %arg4: memref<128x128xf32, #tpu.memory_space<vmem>>, %arg5: memref<5x128x128xf32, #tpu.memory_space<vmem>>, %arg6: memref<3x1x128xf32, #tpu.memory_space<vmem>>, %arg7: memref<128x128xf32, #tpu.memory_space<vmem>>, %arg8: memref<1x128xf32, #tpu.memory_space<vmem>>, %arg9: memref<4x8x128xf32, #tpu.memory_space<vmem>>, %arg10: memref<3x8x128xf32, #tpu.memory_space<vmem>>) attributes {dimension_semantics = [#tpu.dimension_semantics<parallel>, #tpu.dimension_semantics<arbitrary>], iteration_bounds = array<i64: 1, 3>, scalar_prefetch = 0 : i64, scratch_operands = 0 : i64, tpu.core_type = #tpu.core_type<tc>, window_params = [{transform_indices = @transform_0, window_bounds = array<i64: 4, 8, 128>}, {transform_indices = @transform_1, window_bounds = array<i64: 3, 8, 128>}, {pipeline_mode = #tpu.pipeline_mode<synchronous>, transform_indices = @transform_2, window_bounds = array<i64: 128, 128>}, {pipeline_mode = #tpu.pipeline_mode<synchronous>, transform_indices = @transform_3, window_bounds = array<i64: 5, 128, 128>}, {pipeline_mode = #tpu.pipeline_mode<synchronous>, transform_indices = @transform_4, window_bounds = array<i64: 3, 1, 128>}, {pipeline_mode = #tpu.pipeline_mode<synchronous>, transform_indices = @transform_5, window_bounds = array<i64: 128, 128>}, {pipeline_mode = #tpu.pipeline_mode<synchronous>, transform_indices = @transform_6, window_bounds = array<i64: 1, 128>}, {transform_indices = @transform_7, window_bounds = array<i64: 4, 8, 128>}, {transform_indices = @transform_8, window_bounds = array<i64: 3, 8, 128>}]} {
    %c0_i32 = arith.constant 0 : i32
    %0 = arith.cmpi eq, %arg1, %c0_i32 : i32
    %1 = arith.extui %0 : i1 to i32
    %c0_i32_0 = arith.constant 0 : i32
    %2 = arith.cmpi ne, %1, %c0_i32_0 : i32
    scf.if %2 {
      %c0 = arith.constant 0 : index
      %c0_12 = arith.constant 0 : index
      %c0_13 = arith.constant 0 : index
      %23 = vector.load %arg3[%c0, %c0_12, %c0_13] : memref<3x8x128xf32, #tpu.memory_space<vmem>>, vector<3x8x128xf32>
      %c0_14 = arith.constant 0 : index
      %c0_15 = arith.constant 0 : index
      %c0_16 = arith.constant 0 : index
      %24 = vector.load %arg10[%c0_14, %c0_15, %c0_16] : memref<3x8x128xf32, #tpu.memory_space<vmem>>, vector<3x8x128xf32>
      tpu.vector_store %arg10[%c0_14, %c0_15, %c0_16], %23 {strides = array<i32>} : memref<3x8x128xf32, #tpu.memory_space<vmem>>, vector<3x8x128xf32>,
    } else {
    }
    %c4_i32 = arith.constant 4 : i32
    %3 = arith.muli %arg1, %c4_i32 : i32
    %c0_i32_1 = arith.constant 0 : i32
    %4 = arith.addi %3, %c0_i32_1 : i32
    %c10_i32 = arith.constant 10 : i32
    %5 = arith.cmpi slt, %4, %c10_i32 : i32
    %6 = arith.extui %5 : i1 to i32
    %c0_i32_2 = arith.constant 0 : i32
    %7 = arith.cmpi ne, %6, %c0_i32_2 : i32
    scf.if %7 {
      %c0 = arith.constant 0 : index
      %c0_12 = arith.constant 0 : index
      %c0_13 = arith.constant 0 : index
      %23 = vector.load %arg2[%c0, %c0_12, %c0_13] : memref<4x8x128xf32, #tpu.memory_space<vmem>>, vector<1x8x128xf32>
      %24 = vector.shape_cast %23 : vector<1x8x128xf32> to vector<8x128xf32>
      %c0_14 = arith.constant 0 : index
      %c0_15 = arith.constant 0 : index
      %c0_16 = arith.constant 0 : index
      %25 = vector.load %arg10[%c0_14, %c0_15, %c0_16] : memref<3x8x128xf32, #tpu.memory_space<vmem>>, vector<1x8x128xf32>
      %26 = vector.shape_cast %25 : vector<1x8x128xf32> to vector<8x128xf32>
      %c1 = arith.constant 1 : index
      %c0_17 = arith.constant 0 : index
      %c0_18 = arith.constant 0 : index
      %27 = vector.load %arg10[%c1, %c0_17, %c0_18] : memref<3x8x128xf32, #tpu.memory_space<vmem>>, vector<1x8x128xf32>
      %28 = vector.shape_cast %27 : vector<1x8x128xf32> to vector<8x128xf32>
      %c2 = arith.constant 2 : index
      %c0_19 = arith.constant 0 : index
      %c0_20 = arith.constant 0 : index
      %29 = vector.load %arg10[%c2, %c0_19, %c0_20] : memref<3x8x128xf32, #tpu.memory_space<vmem>>, vector<1x8x128xf32>
      %30 = vector.shape_cast %29 : vector<1x8x128xf32> to vector<8x128xf32>
      %c0_21 = arith.constant 0 : index
      %c0_22 = arith.constant 0 : index
      %31 = vector.load %arg4[%c0_21, %c0_22] : memref<128x128xf32, #tpu.memory_space<vmem>>, vector<128x128xf32>
      %cst = arith.constant dense<0.000000e+00> : vector<8x128xf32>
      %32 = tpu.matmul %24, %31, %cst {dimension_numbers = #tpu.dot_dimension_numbers<[1], [0], [0], [1], [0, 0, 1, 1], [], []>} : vector<8x128xf32>, vector<128x128xf32>, vector<8x128xf32> -> vector<8x128xf32>
      %c0_23 = arith.constant 0 : index
      %c0_24 = arith.constant 0 : index
      %c0_25 = arith.constant 0 : index
      %33 = vector.load %arg5[%c0_23, %c0_24, %c0_25] : memref<5x128x128xf32, #tpu.memory_space<vmem>>, vector<1x128x128xf32>
      %34 = vector.shape_cast %33 : vector<1x128x128xf32> to vector<128x128xf32>
      %cst_26 = arith.constant dense<0.000000e+00> : vector<8x128xf32>
      %35 = tpu.matmul %26, %34, %cst_26 {dimension_numbers = #tpu.dot_dimension_numbers<[1], [0], [0], [1], [0, 0, 1, 1], [], []>} : vector<8x128xf32>, vector<128x128xf32>, vector<8x128xf32> -> vector<8x128xf32>
      %36 = arith.addf %32, %35 : vector<8x128xf32>
      %c0_27 = arith.constant 0 : index
      %c0_28 = arith.constant 0 : index
      %c0_29 = arith.constant 0 : index
      %37 = vector.load %arg6[%c0_27, %c0_28, %c0_29] : memref<3x1x128xf32, #tpu.memory_space<vmem>>, vector<1x1x128xf32>
      %38 = vector.shape_cast %37 : vector<1x1x128xf32> to vector<1x128xf32>
      %39 = vector.broadcast %38 : vector<1x128xf32> to vector<8x128xf32>
      %40 = arith.addf %36, %39 : vector<8x128xf32>
      %cst_30 = arith.constant 0.000000e+00 : f32
      %41 = vector.broadcast %cst_30 : f32 to vector<8x128xf32>
      %42 = arith.maximumf %40, %41 : vector<8x128xf32>
      %c1_31 = arith.constant 1 : index
      %c0_32 = arith.constant 0 : index
      %c0_33 = arith.constant 0 : index
      %43 = vector.load %arg5[%c1_31, %c0_32, %c0_33] : memref<5x128x128xf32, #tpu.memory_space<vmem>>, vector<1x128x128xf32>
      %44 = vector.shape_cast %43 : vector<1x128x128xf32> to vector<128x128xf32>
      %cst_34 = arith.constant dense<0.000000e+00> : vector<8x128xf32>
      %45 = tpu.matmul %42, %44, %cst_34 {dimension_numbers = #tpu.dot_dimension_numbers<[1], [0], [0], [1], [0, 0, 1, 1], [], []>} : vector<8x128xf32>, vector<128x128xf32>, vector<8x128xf32> -> vector<8x128xf32>
      %c2_35 = arith.constant 2 : index
      %c0_36 = arith.constant 0 : index
      %c0_37 = arith.constant 0 : index
      %46 = vector.load %arg5[%c2_35, %c0_36, %c0_37] : memref<5x128x128xf32, #tpu.memory_space<vmem>>, vector<1x128x128xf32>
      %47 = vector.shape_cast %46 : vector<1x128x128xf32> to vector<128x128xf32>
      %cst_38 = arith.constant dense<0.000000e+00> : vector<8x128xf32>
      %48 = tpu.matmul %28, %47, %cst_38 {dimension_numbers = #tpu.dot_dimension_numbers<[1], [0], [0], [1], [0, 0, 1, 1], [], []>} : vector<8x128xf32>, vector<128x128xf32>, vector<8x128xf32> -> vector<8x128xf32>
      %49 = arith.addf %45, %48 : vector<8x128xf32>
      %c1_39 = arith.constant 1 : index
      %c0_40 = arith.constant 0 : index
      %c0_41 = arith.constant 0 : index
      %50 = vector.load %arg6[%c1_39, %c0_40, %c0_41] : memref<3x1x128xf32, #tpu.memory_space<vmem>>, vector<1x1x128xf32>
      %51 = vector.shape_cast %50 : vector<1x1x128xf32> to vector<1x128xf32>
      %52 = vector.broadcast %51 : vector<1x128xf32> to vector<8x128xf32>
      %53 = arith.addf %49, %52 : vector<8x128xf32>
      %cst_42 = arith.constant 0.000000e+00 : f32
      %54 = vector.broadcast %cst_42 : f32 to vector<8x128xf32>
      %55 = arith.maximumf %53, %54 : vector<8x128xf32>
      %c3 = arith.constant 3 : index
      %c0_43 = arith.constant 0 : index
      %c0_44 = arith.constant 0 : index
      %56 = vector.load %arg5[%c3, %c0_43, %c0_44] : memref<5x128x128xf32, #tpu.memory_space<vmem>>, vector<1x128x128xf32>
      %57 = vector.shape_cast %56 : vector<1x128x128xf32> to vector<128x128xf32>
      %cst_45 = arith.constant dense<0.000000e+00> : vector<8x128xf32>
      %58 = tpu.matmul %55, %57, %cst_45 {dimension_numbers = #tpu.dot_dimension_numbers<[1], [0], [0], [1], [0, 0, 1, 1], [], []>} : vector<8x128xf32>, vector<128x128xf32>, vector<8x128xf32> -> vector<8x128xf32>
      %c4 = arith.constant 4 : index
      %c0_46 = arith.constant 0 : index
      %c0_47 = arith.constant 0 : index
      %59 = vector.load %arg5[%c4, %c0_46, %c0_47] : memref<5x128x128xf32, #tpu.memory_space<vmem>>, vector<1x128x128xf32>
      %60 = vector.shape_cast %59 : vector<1x128x128xf32> to vector<128x128xf32>
      %cst_48 = arith.constant dense<0.000000e+00> : vector<8x128xf32>
      %61 = tpu.matmul %30, %60, %cst_48 {dimension_numbers = #tpu.dot_dimension_numbers<[1], [0], [0], [1], [0, 0, 1, 1], [], []>} : vector<8x128xf32>, vector<128x128xf32>, vector<8x128xf32> -> vector<8x128xf32>
      %62 = arith.addf %58, %61 : vector<8x128xf32>
      %c2_49 = arith.constant 2 : index
      %c0_50 = arith.constant 0 : index
      %c0_51 = arith.constant 0 : index
      %63 = vector.load %arg6[%c2_49, %c0_50, %c0_51] : memref<3x1x128xf32, #tpu.memory_space<vmem>>, vector<1x1x128xf32>
      %64 = vector.shape_cast %63 : vector<1x1x128xf32> to vector<1x128xf32>
      %65 = vector.broadcast %64 : vector<1x128xf32> to vector<8x128xf32>
      %66 = arith.addf %62, %65 : vector<8x128xf32>
      %cst_52 = arith.constant 0.000000e+00 : f32
      %67 = vector.broadcast %cst_52 : f32 to vector<8x128xf32>
      %68 = arith.maximumf %66, %67 : vector<8x128xf32>
      %c0_53 = arith.constant 0 : index
      %c0_54 = arith.constant 0 : index
      %69 = vector.load %arg7[%c0_53, %c0_54] : memref<128x128xf32, #tpu.memory_space<vmem>>, vector<128x128xf32>
      %cst_55 = arith.constant dense<0.000000e+00> : vector<8x128xf32>
      %70 = tpu.matmul %68, %69, %cst_55 {dimension_numbers = #tpu.dot_dimension_numbers<[1], [0], [0], [1], [0, 0, 1, 1], [], []>} : vector<8x128xf32>, vector<128x128xf32>, vector<8x128xf32> -> vector<8x128xf32>
      %c0_56 = arith.constant 0 : index
      %c0_57 = arith.constant 0 : index
      %71 = vector.load %arg8[%c0_56, %c0_57] : memref<1x128xf32, #tpu.memory_space<vmem>>, vector<1x128xf32>
      %72 = vector.broadcast %71 : vector<1x128xf32> to vector<8x128xf32>
      %73 = arith.addf %70, %72 : vector<8x128xf32>
      %cst_58 = arith.constant dense<0xFF800000> : vector<8xf32>
      %74 = vector.multi_reduction <maximumf>, %73, %cst_58 [1] : vector<8x128xf32> to vector<8xf32>
      %75 = vector.shape_cast %74 : vector<8xf32> to vector<8x1xf32>
      %76 = vector.broadcast %75 : vector<8x1xf32> to vector<8x128xf32>
      %77 = arith.subf %73, %76 : vector<8x128xf32>
      %78 = math.exp %77 : vector<8x128xf32>
      %cst_59 = arith.constant dense<0.000000e+00> : vector<8xf32>
      %79 = vector.multi_reduction <add>, %78, %cst_59 [1] : vector<8x128xf32> to vector<8xf32>
      %80 = vector.shape_cast %79 : vector<8xf32> to vector<8x1xf32>
      %81 = math.log %80 : vector<8x1xf32>
      %82 = vector.broadcast %81 : vector<8x1xf32> to vector<8x128xf32>
      %83 = arith.subf %77, %82 : vector<8x128xf32>
      %c0_60 = arith.constant 0 : index
      %c0_61 = arith.constant 0 : index
      %c0_62 = arith.constant 0 : index
      %84 = vector.load %arg9[%c0_60, %c0_61, %c0_62] : memref<4x8x128xf32, #tpu.memory_space<vmem>>, vector<1x8x128xf32>
      %85 = vector.shape_cast %84 : vector<1x8x128xf32> to vector<8x128xf32>
      %86 = vector.shape_cast %83 : vector<8x128xf32> to vector<1x8x128xf32>
      tpu.vector_store %arg9[%c0_60, %c0_61, %c0_62], %86 {strides = array<i32>} : memref<4x8x128xf32, #tpu.memory_space<vmem>>, vector<1x8x128xf32>,
      %c0_63 = arith.constant 0 : index
      %c0_64 = arith.constant 0 : index
      %c0_65 = arith.constant 0 : index
      %87 = vector.load %arg10[%c0_63, %c0_64, %c0_65] : memref<3x8x128xf32, #tpu.memory_space<vmem>>, vector<1x8x128xf32>
      %88 = vector.shape_cast %87 : vector<1x8x128xf32> to vector<8x128xf32>
      %89 = vector.shape_cast %42 : vector<8x128xf32> to vector<1x8x128xf32>
      tpu.vector_store %arg10[%c0_63, %c0_64, %c0_65], %89 {strides = array<i32>} : memref<3x8x128xf32, #tpu.memory_space<vmem>>, vector<1x8x128xf32>,
      %c1_66 = arith.constant 1 : index
      %c0_67 = arith.constant 0 : index
      %c0_68 = arith.constant 0 : index
      %90 = vector.load %arg10[%c1_66, %c0_67, %c0_68] : memref<3x8x128xf32, #tpu.memory_space<vmem>>, vector<1x8x128xf32>
      %91 = vector.shape_cast %90 : vector<1x8x128xf32> to vector<8x128xf32>
      %92 = vector.shape_cast %55 : vector<8x128xf32> to vector<1x8x128xf32>
      tpu.vector_store %arg10[%c1_66, %c0_67, %c0_68], %92 {strides = array<i32>} : memref<3x8x128xf32, #tpu.memory_space<vmem>>, vector<1x8x128xf32>,
      %c2_69 = arith.constant 2 : index
      %c0_70 = arith.constant 0 : index
      %c0_71 = arith.constant 0 : index
      %93 = vector.load %arg10[%c2_69, %c0_70, %c0_71] : memref<3x8x128xf32, #tpu.memory_space<vmem>>, vector<1x8x128xf32>
      %94 = vector.shape_cast %93 : vector<1x8x128xf32> to vector<8x128xf32>
      %95 = vector.shape_cast %68 : vector<8x128xf32> to vector<1x8x128xf32>
      tpu.vector_store %arg10[%c2_69, %c0_70, %c0_71], %95 {strides = array<i32>} : memref<3x8x128xf32, #tpu.memory_space<vmem>>, vector<1x8x128xf32>,
    } else {
    }
    %c4_i32_3 = arith.constant 4 : i32
    %8 = arith.muli %arg1, %c4_i32_3 : i32
    %c1_i32 = arith.constant 1 : i32
    %9 = arith.addi %8, %c1_i32 : i32
    %c10_i32_4 = arith.constant 10 : i32
    %10 = arith.cmpi slt, %9, %c10_i32_4 : i32
    %11 = arith.extui %10 : i1 to i32
    %c0_i32_5 = arith.constant 0 : i32
    %12 = arith.cmpi ne, %11, %c0_i32_5 : i32
    scf.if %12 {
      %c1 = arith.constant 1 : index
      %c0 = arith.constant 0 : index
      %c0_12 = arith.constant 0 : index
      %23 = vector.load %arg2[%c1, %c0, %c0_12] : memref<4x8x128xf32, #tpu.memory_space<vmem>>, vector<1x8x128xf32>
      %24 = vector.shape_cast %23 : vector<1x8x128xf32> to vector<8x128xf32>
      %c0_13 = arith.constant 0 : index
      %c0_14 = arith.constant 0 : index
      %c0_15 = arith.constant 0 : index
      %25 = vector.load %arg10[%c0_13, %c0_14, %c0_15] : memref<3x8x128xf32, #tpu.memory_space<vmem>>, vector<1x8x128xf32>
      %26 = vector.shape_cast %25 : vector<1x8x128xf32> to vector<8x128xf32>
      %c1_16 = arith.constant 1 : index
      %c0_17 = arith.constant 0 : index
      %c0_18 = arith.constant 0 : index
      %27 = vector.load %arg10[%c1_16, %c0_17, %c0_18] : memref<3x8x128xf32, #tpu.memory_space<vmem>>, vector<1x8x128xf32>
      %28 = vector.shape_cast %27 : vector<1x8x128xf32> to vector<8x128xf32>
      %c2 = arith.constant 2 : index
      %c0_19 = arith.constant 0 : index
      %c0_20 = arith.constant 0 : index
      %29 = vector.load %arg10[%c2, %c0_19, %c0_20] : memref<3x8x128xf32, #tpu.memory_space<vmem>>, vector<1x8x128xf32>
      %30 = vector.shape_cast %29 : vector<1x8x128xf32> to vector<8x128xf32>
      %c0_21 = arith.constant 0 : index
      %c0_22 = arith.constant 0 : index
      %31 = vector.load %arg4[%c0_21, %c0_22] : memref<128x128xf32, #tpu.memory_space<vmem>>, vector<128x128xf32>
      %cst = arith.constant dense<0.000000e+00> : vector<8x128xf32>
      %32 = tpu.matmul %24, %31, %cst {dimension_numbers = #tpu.dot_dimension_numbers<[1], [0], [0], [1], [0, 0, 1, 1], [], []>} : vector<8x128xf32>, vector<128x128xf32>, vector<8x128xf32> -> vector<8x128xf32>
      %c0_23 = arith.constant 0 : index
      %c0_24 = arith.constant 0 : index
      %c0_25 = arith.constant 0 : index
      %33 = vector.load %arg5[%c0_23, %c0_24, %c0_25] : memref<5x128x128xf32, #tpu.memory_space<vmem>>, vector<1x128x128xf32>
      %34 = vector.shape_cast %33 : vector<1x128x128xf32> to vector<128x128xf32>
      %cst_26 = arith.constant dense<0.000000e+00> : vector<8x128xf32>
      %35 = tpu.matmul %26, %34, %cst_26 {dimension_numbers = #tpu.dot_dimension_numbers<[1], [0], [0], [1], [0, 0, 1, 1], [], []>} : vector<8x128xf32>, vector<128x128xf32>, vector<8x128xf32> -> vector<8x128xf32>
      %36 = arith.addf %32, %35 : vector<8x128xf32>
      %c0_27 = arith.constant 0 : index
      %c0_28 = arith.constant 0 : index
      %c0_29 = arith.constant 0 : index
      %37 = vector.load %arg6[%c0_27, %c0_28, %c0_29] : memref<3x1x128xf32, #tpu.memory_space<vmem>>, vector<1x1x128xf32>
      %38 = vector.shape_cast %37 : vector<1x1x128xf32> to vector<1x128xf32>
      %39 = vector.broadcast %38 : vector<1x128xf32> to vector<8x128xf32>
      %40 = arith.addf %36, %39 : vector<8x128xf32>
      %cst_30 = arith.constant 0.000000e+00 : f32
      %41 = vector.broadcast %cst_30 : f32 to vector<8x128xf32>
      %42 = arith.maximumf %40, %41 : vector<8x128xf32>
      %c1_31 = arith.constant 1 : index
      %c0_32 = arith.constant 0 : index
      %c0_33 = arith.constant 0 : index
      %43 = vector.load %arg5[%c1_31, %c0_32, %c0_33] : memref<5x128x128xf32, #tpu.memory_space<vmem>>, vector<1x128x128xf32>
      %44 = vector.shape_cast %43 : vector<1x128x128xf32> to vector<128x128xf32>
      %cst_34 = arith.constant dense<0.000000e+00> : vector<8x128xf32>
      %45 = tpu.matmul %42, %44, %cst_34 {dimension_numbers = #tpu.dot_dimension_numbers<[1], [0], [0], [1], [0, 0, 1, 1], [], []>} : vector<8x128xf32>, vector<128x128xf32>, vector<8x128xf32> -> vector<8x128xf32>
      %c2_35 = arith.constant 2 : index
      %c0_36 = arith.constant 0 : index
      %c0_37 = arith.constant 0 : index
      %46 = vector.load %arg5[%c2_35, %c0_36, %c0_37] : memref<5x128x128xf32, #tpu.memory_space<vmem>>, vector<1x128x128xf32>
      %47 = vector.shape_cast %46 : vector<1x128x128xf32> to vector<128x128xf32>
      %cst_38 = arith.constant dense<0.000000e+00> : vector<8x128xf32>
      %48 = tpu.matmul %28, %47, %cst_38 {dimension_numbers = #tpu.dot_dimension_numbers<[1], [0], [0], [1], [0, 0, 1, 1], [], []>} : vector<8x128xf32>, vector<128x128xf32>, vector<8x128xf32> -> vector<8x128xf32>
      %49 = arith.addf %45, %48 : vector<8x128xf32>
      %c1_39 = arith.constant 1 : index
      %c0_40 = arith.constant 0 : index
      %c0_41 = arith.constant 0 : index
      %50 = vector.load %arg6[%c1_39, %c0_40, %c0_41] : memref<3x1x128xf32, #tpu.memory_space<vmem>>, vector<1x1x128xf32>
      %51 = vector.shape_cast %50 : vector<1x1x128xf32> to vector<1x128xf32>
      %52 = vector.broadcast %51 : vector<1x128xf32> to vector<8x128xf32>
      %53 = arith.addf %49, %52 : vector<8x128xf32>
      %cst_42 = arith.constant 0.000000e+00 : f32
      %54 = vector.broadcast %cst_42 : f32 to vector<8x128xf32>
      %55 = arith.maximumf %53, %54 : vector<8x128xf32>
      %c3 = arith.constant 3 : index
      %c0_43 = arith.constant 0 : index
      %c0_44 = arith.constant 0 : index
      %56 = vector.load %arg5[%c3, %c0_43, %c0_44] : memref<5x128x128xf32, #tpu.memory_space<vmem>>, vector<1x128x128xf32>
      %57 = vector.shape_cast %56 : vector<1x128x128xf32> to vector<128x128xf32>
      %cst_45 = arith.constant dense<0.000000e+00> : vector<8x128xf32>
      %58 = tpu.matmul %55, %57, %cst_45 {dimension_numbers = #tpu.dot_dimension_numbers<[1], [0], [0], [1], [0, 0, 1, 1], [], []>} : vector<8x128xf32>, vector<128x128xf32>, vector<8x128xf32> -> vector<8x128xf32>
      %c4 = arith.constant 4 : index
      %c0_46 = arith.constant 0 : index
      %c0_47 = arith.constant 0 : index
      %59 = vector.load %arg5[%c4, %c0_46, %c0_47] : memref<5x128x128xf32, #tpu.memory_space<vmem>>, vector<1x128x128xf32>
      %60 = vector.shape_cast %59 : vector<1x128x128xf32> to vector<128x128xf32>
      %cst_48 = arith.constant dense<0.000000e+00> : vector<8x128xf32>
      %61 = tpu.matmul %30, %60, %cst_48 {dimension_numbers = #tpu.dot_dimension_numbers<[1], [0], [0], [1], [0, 0, 1, 1], [], []>} : vector<8x128xf32>, vector<128x128xf32>, vector<8x128xf32> -> vector<8x128xf32>
      %62 = arith.addf %58, %61 : vector<8x128xf32>
      %c2_49 = arith.constant 2 : index
      %c0_50 = arith.constant 0 : index
      %c0_51 = arith.constant 0 : index
      %63 = vector.load %arg6[%c2_49, %c0_50, %c0_51] : memref<3x1x128xf32, #tpu.memory_space<vmem>>, vector<1x1x128xf32>
      %64 = vector.shape_cast %63 : vector<1x1x128xf32> to vector<1x128xf32>
      %65 = vector.broadcast %64 : vector<1x128xf32> to vector<8x128xf32>
      %66 = arith.addf %62, %65 : vector<8x128xf32>
      %cst_52 = arith.constant 0.000000e+00 : f32
      %67 = vector.broadcast %cst_52 : f32 to vector<8x128xf32>
      %68 = arith.maximumf %66, %67 : vector<8x128xf32>
      %c0_53 = arith.constant 0 : index
      %c0_54 = arith.constant 0 : index
      %69 = vector.load %arg7[%c0_53, %c0_54] : memref<128x128xf32, #tpu.memory_space<vmem>>, vector<128x128xf32>
      %cst_55 = arith.constant dense<0.000000e+00> : vector<8x128xf32>
      %70 = tpu.matmul %68, %69, %cst_55 {dimension_numbers = #tpu.dot_dimension_numbers<[1], [0], [0], [1], [0, 0, 1, 1], [], []>} : vector<8x128xf32>, vector<128x128xf32>, vector<8x128xf32> -> vector<8x128xf32>
      %c0_56 = arith.constant 0 : index
      %c0_57 = arith.constant 0 : index
      %71 = vector.load %arg8[%c0_56, %c0_57] : memref<1x128xf32, #tpu.memory_space<vmem>>, vector<1x128xf32>
      %72 = vector.broadcast %71 : vector<1x128xf32> to vector<8x128xf32>
      %73 = arith.addf %70, %72 : vector<8x128xf32>
      %cst_58 = arith.constant dense<0xFF800000> : vector<8xf32>
      %74 = vector.multi_reduction <maximumf>, %73, %cst_58 [1] : vector<8x128xf32> to vector<8xf32>
      %75 = vector.shape_cast %74 : vector<8xf32> to vector<8x1xf32>
      %76 = vector.broadcast %75 : vector<8x1xf32> to vector<8x128xf32>
      %77 = arith.subf %73, %76 : vector<8x128xf32>
      %78 = math.exp %77 : vector<8x128xf32>
      %cst_59 = arith.constant dense<0.000000e+00> : vector<8xf32>
      %79 = vector.multi_reduction <add>, %78, %cst_59 [1] : vector<8x128xf32> to vector<8xf32>
      %80 = vector.shape_cast %79 : vector<8xf32> to vector<8x1xf32>
      %81 = math.log %80 : vector<8x1xf32>
      %82 = vector.broadcast %81 : vector<8x1xf32> to vector<8x128xf32>
      %83 = arith.subf %77, %82 : vector<8x128xf32>
      %c1_60 = arith.constant 1 : index
      %c0_61 = arith.constant 0 : index
      %c0_62 = arith.constant 0 : index
      %84 = vector.load %arg9[%c1_60, %c0_61, %c0_62] : memref<4x8x128xf32, #tpu.memory_space<vmem>>, vector<1x8x128xf32>
      %85 = vector.shape_cast %84 : vector<1x8x128xf32> to vector<8x128xf32>
      %86 = vector.shape_cast %83 : vector<8x128xf32> to vector<1x8x128xf32>
      tpu.vector_store %arg9[%c1_60, %c0_61, %c0_62], %86 {strides = array<i32>} : memref<4x8x128xf32, #tpu.memory_space<vmem>>, vector<1x8x128xf32>,
      %c0_63 = arith.constant 0 : index
      %c0_64 = arith.constant 0 : index
      %c0_65 = arith.constant 0 : index
      %87 = vector.load %arg10[%c0_63, %c0_64, %c0_65] : memref<3x8x128xf32, #tpu.memory_space<vmem>>, vector<1x8x128xf32>
      %88 = vector.shape_cast %87 : vector<1x8x128xf32> to vector<8x128xf32>
      %89 = vector.shape_cast %42 : vector<8x128xf32> to vector<1x8x128xf32>
      tpu.vector_store %arg10[%c0_63, %c0_64, %c0_65], %89 {strides = array<i32>} : memref<3x8x128xf32, #tpu.memory_space<vmem>>, vector<1x8x128xf32>,
      %c1_66 = arith.constant 1 : index
      %c0_67 = arith.constant 0 : index
      %c0_68 = arith.constant 0 : index
      %90 = vector.load %arg10[%c1_66, %c0_67, %c0_68] : memref<3x8x128xf32, #tpu.memory_space<vmem>>, vector<1x8x128xf32>
      %91 = vector.shape_cast %90 : vector<1x8x128xf32> to vector<8x128xf32>
      %92 = vector.shape_cast %55 : vector<8x128xf32> to vector<1x8x128xf32>
      tpu.vector_store %arg10[%c1_66, %c0_67, %c0_68], %92 {strides = array<i32>} : memref<3x8x128xf32, #tpu.memory_space<vmem>>, vector<1x8x128xf32>,
      %c2_69 = arith.constant 2 : index
      %c0_70 = arith.constant 0 : index
      %c0_71 = arith.constant 0 : index
      %93 = vector.load %arg10[%c2_69, %c0_70, %c0_71] : memref<3x8x128xf32, #tpu.memory_space<vmem>>, vector<1x8x128xf32>
      %94 = vector.shape_cast %93 : vector<1x8x128xf32> to vector<8x128xf32>
      %95 = vector.shape_cast %68 : vector<8x128xf32> to vector<1x8x128xf32>
      tpu.vector_store %arg10[%c2_69, %c0_70, %c0_71], %95 {strides = array<i32>} : memref<3x8x128xf32, #tpu.memory_space<vmem>>, vector<1x8x128xf32>,
    } else {
    }
    %c4_i32_6 = arith.constant 4 : i32
    %13 = arith.muli %arg1, %c4_i32_6 : i32
    %c2_i32 = arith.constant 2 : i32
    %14 = arith.addi %13, %c2_i32 : i32
    %c10_i32_7 = arith.constant 10 : i32
    %15 = arith.cmpi slt, %14, %c10_i32_7 : i32
    %16 = arith.extui %15 : i1 to i32
    %c0_i32_8 = arith.constant 0 : i32
    %17 = arith.cmpi ne, %16, %c0_i32_8 : i32
    scf.if %17 {
      %c2 = arith.constant 2 : index
      %c0 = arith.constant 0 : index
      %c0_12 = arith.constant 0 : index
      %23 = vector.load %arg2[%c2, %c0, %c0_12] : memref<4x8x128xf32, #tpu.memory_space<vmem>>, vector<1x8x128xf32>
      %24 = vector.shape_cast %23 : vector<1x8x128xf32> to vector<8x128xf32>
      %c0_13 = arith.constant 0 : index
      %c0_14 = arith.constant 0 : index
      %c0_15 = arith.constant 0 : index
      %25 = vector.load %arg10[%c0_13, %c0_14, %c0_15] : memref<3x8x128xf32, #tpu.memory_space<vmem>>, vector<1x8x128xf32>
      %26 = vector.shape_cast %25 : vector<1x8x128xf32> to vector<8x128xf32>
      %c1 = arith.constant 1 : index
      %c0_16 = arith.constant 0 : index
      %c0_17 = arith.constant 0 : index
      %27 = vector.load %arg10[%c1, %c0_16, %c0_17] : memref<3x8x128xf32, #tpu.memory_space<vmem>>, vector<1x8x128xf32>
      %28 = vector.shape_cast %27 : vector<1x8x128xf32> to vector<8x128xf32>
      %c2_18 = arith.constant 2 : index
      %c0_19 = arith.constant 0 : index
      %c0_20 = arith.constant 0 : index
      %29 = vector.load %arg10[%c2_18, %c0_19, %c0_20] : memref<3x8x128xf32, #tpu.memory_space<vmem>>, vector<1x8x128xf32>
      %30 = vector.shape_cast %29 : vector<1x8x128xf32> to vector<8x128xf32>
      %c0_21 = arith.constant 0 : index
      %c0_22 = arith.constant 0 : index
      %31 = vector.load %arg4[%c0_21, %c0_22] : memref<128x128xf32, #tpu.memory_space<vmem>>, vector<128x128xf32>
      %cst = arith.constant dense<0.000000e+00> : vector<8x128xf32>
      %32 = tpu.matmul %24, %31, %cst {dimension_numbers = #tpu.dot_dimension_numbers<[1], [0], [0], [1], [0, 0, 1, 1], [], []>} : vector<8x128xf32>, vector<128x128xf32>, vector<8x128xf32> -> vector<8x128xf32>
      %c0_23 = arith.constant 0 : index
      %c0_24 = arith.constant 0 : index
      %c0_25 = arith.constant 0 : index
      %33 = vector.load %arg5[%c0_23, %c0_24, %c0_25] : memref<5x128x128xf32, #tpu.memory_space<vmem>>, vector<1x128x128xf32>
      %34 = vector.shape_cast %33 : vector<1x128x128xf32> to vector<128x128xf32>
      %cst_26 = arith.constant dense<0.000000e+00> : vector<8x128xf32>
      %35 = tpu.matmul %26, %34, %cst_26 {dimension_numbers = #tpu.dot_dimension_numbers<[1], [0], [0], [1], [0, 0, 1, 1], [], []>} : vector<8x128xf32>, vector<128x128xf32>, vector<8x128xf32> -> vector<8x128xf32>
      %36 = arith.addf %32, %35 : vector<8x128xf32>
      %c0_27 = arith.constant 0 : index
      %c0_28 = arith.constant 0 : index
      %c0_29 = arith.constant 0 : index
      %37 = vector.load %arg6[%c0_27, %c0_28, %c0_29] : memref<3x1x128xf32, #tpu.memory_space<vmem>>, vector<1x1x128xf32>
      %38 = vector.shape_cast %37 : vector<1x1x128xf32> to vector<1x128xf32>
      %39 = vector.broadcast %38 : vector<1x128xf32> to vector<8x128xf32>
      %40 = arith.addf %36, %39 : vector<8x128xf32>
      %cst_30 = arith.constant 0.000000e+00 : f32
      %41 = vector.broadcast %cst_30 : f32 to vector<8x128xf32>
      %42 = arith.maximumf %40, %41 : vector<8x128xf32>
      %c1_31 = arith.constant 1 : index
      %c0_32 = arith.constant 0 : index
      %c0_33 = arith.constant 0 : index
      %43 = vector.load %arg5[%c1_31, %c0_32, %c0_33] : memref<5x128x128xf32, #tpu.memory_space<vmem>>, vector<1x128x128xf32>
      %44 = vector.shape_cast %43 : vector<1x128x128xf32> to vector<128x128xf32>
      %cst_34 = arith.constant dense<0.000000e+00> : vector<8x128xf32>
      %45 = tpu.matmul %42, %44, %cst_34 {dimension_numbers = #tpu.dot_dimension_numbers<[1], [0], [0], [1], [0, 0, 1, 1], [], []>} : vector<8x128xf32>, vector<128x128xf32>, vector<8x128xf32> -> vector<8x128xf32>
      %c2_35 = arith.constant 2 : index
      %c0_36 = arith.constant 0 : index
      %c0_37 = arith.constant 0 : index
      %46 = vector.load %arg5[%c2_35, %c0_36, %c0_37] : memref<5x128x128xf32, #tpu.memory_space<vmem>>, vector<1x128x128xf32>
      %47 = vector.shape_cast %46 : vector<1x128x128xf32> to vector<128x128xf32>
      %cst_38 = arith.constant dense<0.000000e+00> : vector<8x128xf32>
      %48 = tpu.matmul %28, %47, %cst_38 {dimension_numbers = #tpu.dot_dimension_numbers<[1], [0], [0], [1], [0, 0, 1, 1], [], []>} : vector<8x128xf32>, vector<128x128xf32>, vector<8x128xf32> -> vector<8x128xf32>
      %49 = arith.addf %45, %48 : vector<8x128xf32>
      %c1_39 = arith.constant 1 : index
      %c0_40 = arith.constant 0 : index
      %c0_41 = arith.constant 0 : index
      %50 = vector.load %arg6[%c1_39, %c0_40, %c0_41] : memref<3x1x128xf32, #tpu.memory_space<vmem>>, vector<1x1x128xf32>
      %51 = vector.shape_cast %50 : vector<1x1x128xf32> to vector<1x128xf32>
      %52 = vector.broadcast %51 : vector<1x128xf32> to vector<8x128xf32>
      %53 = arith.addf %49, %52 : vector<8x128xf32>
      %cst_42 = arith.constant 0.000000e+00 : f32
      %54 = vector.broadcast %cst_42 : f32 to vector<8x128xf32>
      %55 = arith.maximumf %53, %54 : vector<8x128xf32>
      %c3 = arith.constant 3 : index
      %c0_43 = arith.constant 0 : index
      %c0_44 = arith.constant 0 : index
      %56 = vector.load %arg5[%c3, %c0_43, %c0_44] : memref<5x128x128xf32, #tpu.memory_space<vmem>>, vector<1x128x128xf32>
      %57 = vector.shape_cast %56 : vector<1x128x128xf32> to vector<128x128xf32>
      %cst_45 = arith.constant dense<0.000000e+00> : vector<8x128xf32>
      %58 = tpu.matmul %55, %57, %cst_45 {dimension_numbers = #tpu.dot_dimension_numbers<[1], [0], [0], [1], [0, 0, 1, 1], [], []>} : vector<8x128xf32>, vector<128x128xf32>, vector<8x128xf32> -> vector<8x128xf32>
      %c4 = arith.constant 4 : index
      %c0_46 = arith.constant 0 : index
      %c0_47 = arith.constant 0 : index
      %59 = vector.load %arg5[%c4, %c0_46, %c0_47] : memref<5x128x128xf32, #tpu.memory_space<vmem>>, vector<1x128x128xf32>
      %60 = vector.shape_cast %59 : vector<1x128x128xf32> to vector<128x128xf32>
      %cst_48 = arith.constant dense<0.000000e+00> : vector<8x128xf32>
      %61 = tpu.matmul %30, %60, %cst_48 {dimension_numbers = #tpu.dot_dimension_numbers<[1], [0], [0], [1], [0, 0, 1, 1], [], []>} : vector<8x128xf32>, vector<128x128xf32>, vector<8x128xf32> -> vector<8x128xf32>
      %62 = arith.addf %58, %61 : vector<8x128xf32>
      %c2_49 = arith.constant 2 : index
      %c0_50 = arith.constant 0 : index
      %c0_51 = arith.constant 0 : index
      %63 = vector.load %arg6[%c2_49, %c0_50, %c0_51] : memref<3x1x128xf32, #tpu.memory_space<vmem>>, vector<1x1x128xf32>
      %64 = vector.shape_cast %63 : vector<1x1x128xf32> to vector<1x128xf32>
      %65 = vector.broadcast %64 : vector<1x128xf32> to vector<8x128xf32>
      %66 = arith.addf %62, %65 : vector<8x128xf32>
      %cst_52 = arith.constant 0.000000e+00 : f32
      %67 = vector.broadcast %cst_52 : f32 to vector<8x128xf32>
      %68 = arith.maximumf %66, %67 : vector<8x128xf32>
      %c0_53 = arith.constant 0 : index
      %c0_54 = arith.constant 0 : index
      %69 = vector.load %arg7[%c0_53, %c0_54] : memref<128x128xf32, #tpu.memory_space<vmem>>, vector<128x128xf32>
      %cst_55 = arith.constant dense<0.000000e+00> : vector<8x128xf32>
      %70 = tpu.matmul %68, %69, %cst_55 {dimension_numbers = #tpu.dot_dimension_numbers<[1], [0], [0], [1], [0, 0, 1, 1], [], []>} : vector<8x128xf32>, vector<128x128xf32>, vector<8x128xf32> -> vector<8x128xf32>
      %c0_56 = arith.constant 0 : index
      %c0_57 = arith.constant 0 : index
      %71 = vector.load %arg8[%c0_56, %c0_57] : memref<1x128xf32, #tpu.memory_space<vmem>>, vector<1x128xf32>
      %72 = vector.broadcast %71 : vector<1x128xf32> to vector<8x128xf32>
      %73 = arith.addf %70, %72 : vector<8x128xf32>
      %cst_58 = arith.constant dense<0xFF800000> : vector<8xf32>
      %74 = vector.multi_reduction <maximumf>, %73, %cst_58 [1] : vector<8x128xf32> to vector<8xf32>
      %75 = vector.shape_cast %74 : vector<8xf32> to vector<8x1xf32>
      %76 = vector.broadcast %75 : vector<8x1xf32> to vector<8x128xf32>
      %77 = arith.subf %73, %76 : vector<8x128xf32>
      %78 = math.exp %77 : vector<8x128xf32>
      %cst_59 = arith.constant dense<0.000000e+00> : vector<8xf32>
      %79 = vector.multi_reduction <add>, %78, %cst_59 [1] : vector<8x128xf32> to vector<8xf32>
      %80 = vector.shape_cast %79 : vector<8xf32> to vector<8x1xf32>
      %81 = math.log %80 : vector<8x1xf32>
      %82 = vector.broadcast %81 : vector<8x1xf32> to vector<8x128xf32>
      %83 = arith.subf %77, %82 : vector<8x128xf32>
      %c2_60 = arith.constant 2 : index
      %c0_61 = arith.constant 0 : index
      %c0_62 = arith.constant 0 : index
      %84 = vector.load %arg9[%c2_60, %c0_61, %c0_62] : memref<4x8x128xf32, #tpu.memory_space<vmem>>, vector<1x8x128xf32>
      %85 = vector.shape_cast %84 : vector<1x8x128xf32> to vector<8x128xf32>
      %86 = vector.shape_cast %83 : vector<8x128xf32> to vector<1x8x128xf32>
      tpu.vector_store %arg9[%c2_60, %c0_61, %c0_62], %86 {strides = array<i32>} : memref<4x8x128xf32, #tpu.memory_space<vmem>>, vector<1x8x128xf32>,
      %c0_63 = arith.constant 0 : index
      %c0_64 = arith.constant 0 : index
      %c0_65 = arith.constant 0 : index
      %87 = vector.load %arg10[%c0_63, %c0_64, %c0_65] : memref<3x8x128xf32, #tpu.memory_space<vmem>>, vector<1x8x128xf32>
      %88 = vector.shape_cast %87 : vector<1x8x128xf32> to vector<8x128xf32>
      %89 = vector.shape_cast %42 : vector<8x128xf32> to vector<1x8x128xf32>
      tpu.vector_store %arg10[%c0_63, %c0_64, %c0_65], %89 {strides = array<i32>} : memref<3x8x128xf32, #tpu.memory_space<vmem>>, vector<1x8x128xf32>,
      %c1_66 = arith.constant 1 : index
      %c0_67 = arith.constant 0 : index
      %c0_68 = arith.constant 0 : index
      %90 = vector.load %arg10[%c1_66, %c0_67, %c0_68] : memref<3x8x128xf32, #tpu.memory_space<vmem>>, vector<1x8x128xf32>
      %91 = vector.shape_cast %90 : vector<1x8x128xf32> to vector<8x128xf32>
      %92 = vector.shape_cast %55 : vector<8x128xf32> to vector<1x8x128xf32>
      tpu.vector_store %arg10[%c1_66, %c0_67, %c0_68], %92 {strides = array<i32>} : memref<3x8x128xf32, #tpu.memory_space<vmem>>, vector<1x8x128xf32>,
      %c2_69 = arith.constant 2 : index
      %c0_70 = arith.constant 0 : index
      %c0_71 = arith.constant 0 : index
      %93 = vector.load %arg10[%c2_69, %c0_70, %c0_71] : memref<3x8x128xf32, #tpu.memory_space<vmem>>, vector<1x8x128xf32>
      %94 = vector.shape_cast %93 : vector<1x8x128xf32> to vector<8x128xf32>
      %95 = vector.shape_cast %68 : vector<8x128xf32> to vector<1x8x128xf32>
      tpu.vector_store %arg10[%c2_69, %c0_70, %c0_71], %95 {strides = array<i32>} : memref<3x8x128xf32, #tpu.memory_space<vmem>>, vector<1x8x128xf32>,
    } else {
    }
    %c4_i32_9 = arith.constant 4 : i32
    %18 = arith.muli %arg1, %c4_i32_9 : i32
    %c3_i32 = arith.constant 3 : i32
    %19 = arith.addi %18, %c3_i32 : i32
    %c10_i32_10 = arith.constant 10 : i32
    %20 = arith.cmpi slt, %19, %c10_i32_10 : i32
    %21 = arith.extui %20 : i1 to i32
    %c0_i32_11 = arith.constant 0 : i32
    %22 = arith.cmpi ne, %21, %c0_i32_11 : i32
    scf.if %22 {
      %c3 = arith.constant 3 : index
      %c0 = arith.constant 0 : index
      %c0_12 = arith.constant 0 : index
      %23 = vector.load %arg2[%c3, %c0, %c0_12] : memref<4x8x128xf32, #tpu.memory_space<vmem>>, vector<1x8x128xf32>
      %24 = vector.shape_cast %23 : vector<1x8x128xf32> to vector<8x128xf32>
      %c0_13 = arith.constant 0 : index
      %c0_14 = arith.constant 0 : index
      %c0_15 = arith.constant 0 : index
      %25 = vector.load %arg10[%c0_13, %c0_14, %c0_15] : memref<3x8x128xf32, #tpu.memory_space<vmem>>, vector<1x8x128xf32>
      %26 = vector.shape_cast %25 : vector<1x8x128xf32> to vector<8x128xf32>
      %c1 = arith.constant 1 : index
      %c0_16 = arith.constant 0 : index
      %c0_17 = arith.constant 0 : index
      %27 = vector.load %arg10[%c1, %c0_16, %c0_17] : memref<3x8x128xf32, #tpu.memory_space<vmem>>, vector<1x8x128xf32>
      %28 = vector.shape_cast %27 : vector<1x8x128xf32> to vector<8x128xf32>
      %c2 = arith.constant 2 : index
      %c0_18 = arith.constant 0 : index
      %c0_19 = arith.constant 0 : index
      %29 = vector.load %arg10[%c2, %c0_18, %c0_19] : memref<3x8x128xf32, #tpu.memory_space<vmem>>, vector<1x8x128xf32>
      %30 = vector.shape_cast %29 : vector<1x8x128xf32> to vector<8x128xf32>
      %c0_20 = arith.constant 0 : index
      %c0_21 = arith.constant 0 : index
      %31 = vector.load %arg4[%c0_20, %c0_21] : memref<128x128xf32, #tpu.memory_space<vmem>>, vector<128x128xf32>
      %cst = arith.constant dense<0.000000e+00> : vector<8x128xf32>
      %32 = tpu.matmul %24, %31, %cst {dimension_numbers = #tpu.dot_dimension_numbers<[1], [0], [0], [1], [0, 0, 1, 1], [], []>} : vector<8x128xf32>, vector<128x128xf32>, vector<8x128xf32> -> vector<8x128xf32>
      %c0_22 = arith.constant 0 : index
      %c0_23 = arith.constant 0 : index
      %c0_24 = arith.constant 0 : index
      %33 = vector.load %arg5[%c0_22, %c0_23, %c0_24] : memref<5x128x128xf32, #tpu.memory_space<vmem>>, vector<1x128x128xf32>
      %34 = vector.shape_cast %33 : vector<1x128x128xf32> to vector<128x128xf32>
      %cst_25 = arith.constant dense<0.000000e+00> : vector<8x128xf32>
      %35 = tpu.matmul %26, %34, %cst_25 {dimension_numbers = #tpu.dot_dimension_numbers<[1], [0], [0], [1], [0, 0, 1, 1], [], []>} : vector<8x128xf32>, vector<128x128xf32>, vector<8x128xf32> -> vector<8x128xf32>
      %36 = arith.addf %32, %35 : vector<8x128xf32>
      %c0_26 = arith.constant 0 : index
      %c0_27 = arith.constant 0 : index
      %c0_28 = arith.constant 0 : index
      %37 = vector.load %arg6[%c0_26, %c0_27, %c0_28] : memref<3x1x128xf32, #tpu.memory_space<vmem>>, vector<1x1x128xf32>
      %38 = vector.shape_cast %37 : vector<1x1x128xf32> to vector<1x128xf32>
      %39 = vector.broadcast %38 : vector<1x128xf32> to vector<8x128xf32>
      %40 = arith.addf %36, %39 : vector<8x128xf32>
      %cst_29 = arith.constant 0.000000e+00 : f32
      %41 = vector.broadcast %cst_29 : f32 to vector<8x128xf32>
      %42 = arith.maximumf %40, %41 : vector<8x128xf32>
      %c1_30 = arith.constant 1 : index
      %c0_31 = arith.constant 0 : index
      %c0_32 = arith.constant 0 : index
      %43 = vector.load %arg5[%c1_30, %c0_31, %c0_32] : memref<5x128x128xf32, #tpu.memory_space<vmem>>, vector<1x128x128xf32>
      %44 = vector.shape_cast %43 : vector<1x128x128xf32> to vector<128x128xf32>
      %cst_33 = arith.constant dense<0.000000e+00> : vector<8x128xf32>
      %45 = tpu.matmul %42, %44, %cst_33 {dimension_numbers = #tpu.dot_dimension_numbers<[1], [0], [0], [1], [0, 0, 1, 1], [], []>} : vector<8x128xf32>, vector<128x128xf32>, vector<8x128xf32> -> vector<8x128xf32>
      %c2_34 = arith.constant 2 : index
      %c0_35 = arith.constant 0 : index
      %c0_36 = arith.constant 0 : index
      %46 = vector.load %arg5[%c2_34, %c0_35, %c0_36] : memref<5x128x128xf32, #tpu.memory_space<vmem>>, vector<1x128x128xf32>
      %47 = vector.shape_cast %46 : vector<1x128x128xf32> to vector<128x128xf32>
      %cst_37 = arith.constant dense<0.000000e+00> : vector<8x128xf32>
      %48 = tpu.matmul %28, %47, %cst_37 {dimension_numbers = #tpu.dot_dimension_numbers<[1], [0], [0], [1], [0, 0, 1, 1], [], []>} : vector<8x128xf32>, vector<128x128xf32>, vector<8x128xf32> -> vector<8x128xf32>
      %49 = arith.addf %45, %48 : vector<8x128xf32>
      %c1_38 = arith.constant 1 : index
      %c0_39 = arith.constant 0 : index
      %c0_40 = arith.constant 0 : index
      %50 = vector.load %arg6[%c1_38, %c0_39, %c0_40] : memref<3x1x128xf32, #tpu.memory_space<vmem>>, vector<1x1x128xf32>
      %51 = vector.shape_cast %50 : vector<1x1x128xf32> to vector<1x128xf32>
      %52 = vector.broadcast %51 : vector<1x128xf32> to vector<8x128xf32>
      %53 = arith.addf %49, %52 : vector<8x128xf32>
      %cst_41 = arith.constant 0.000000e+00 : f32
      %54 = vector.broadcast %cst_41 : f32 to vector<8x128xf32>
      %55 = arith.maximumf %53, %54 : vector<8x128xf32>
      %c3_42 = arith.constant 3 : index
      %c0_43 = arith.constant 0 : index
      %c0_44 = arith.constant 0 : index
      %56 = vector.load %arg5[%c3_42, %c0_43, %c0_44] : memref<5x128x128xf32, #tpu.memory_space<vmem>>, vector<1x128x128xf32>
      %57 = vector.shape_cast %56 : vector<1x128x128xf32> to vector<128x128xf32>
      %cst_45 = arith.constant dense<0.000000e+00> : vector<8x128xf32>
      %58 = tpu.matmul %55, %57, %cst_45 {dimension_numbers = #tpu.dot_dimension_numbers<[1], [0], [0], [1], [0, 0, 1, 1], [], []>} : vector<8x128xf32>, vector<128x128xf32>, vector<8x128xf32> -> vector<8x128xf32>
      %c4 = arith.constant 4 : index
      %c0_46 = arith.constant 0 : index
      %c0_47 = arith.constant 0 : index
      %59 = vector.load %arg5[%c4, %c0_46, %c0_47] : memref<5x128x128xf32, #tpu.memory_space<vmem>>, vector<1x128x128xf32>
      %60 = vector.shape_cast %59 : vector<1x128x128xf32> to vector<128x128xf32>
      %cst_48 = arith.constant dense<0.000000e+00> : vector<8x128xf32>
      %61 = tpu.matmul %30, %60, %cst_48 {dimension_numbers = #tpu.dot_dimension_numbers<[1], [0], [0], [1], [0, 0, 1, 1], [], []>} : vector<8x128xf32>, vector<128x128xf32>, vector<8x128xf32> -> vector<8x128xf32>
      %62 = arith.addf %58, %61 : vector<8x128xf32>
      %c2_49 = arith.constant 2 : index
      %c0_50 = arith.constant 0 : index
      %c0_51 = arith.constant 0 : index
      %63 = vector.load %arg6[%c2_49, %c0_50, %c0_51] : memref<3x1x128xf32, #tpu.memory_space<vmem>>, vector<1x1x128xf32>
      %64 = vector.shape_cast %63 : vector<1x1x128xf32> to vector<1x128xf32>
      %65 = vector.broadcast %64 : vector<1x128xf32> to vector<8x128xf32>
      %66 = arith.addf %62, %65 : vector<8x128xf32>
      %cst_52 = arith.constant 0.000000e+00 : f32
      %67 = vector.broadcast %cst_52 : f32 to vector<8x128xf32>
      %68 = arith.maximumf %66, %67 : vector<8x128xf32>
      %c0_53 = arith.constant 0 : index
      %c0_54 = arith.constant 0 : index
      %69 = vector.load %arg7[%c0_53, %c0_54] : memref<128x128xf32, #tpu.memory_space<vmem>>, vector<128x128xf32>
      %cst_55 = arith.constant dense<0.000000e+00> : vector<8x128xf32>
      %70 = tpu.matmul %68, %69, %cst_55 {dimension_numbers = #tpu.dot_dimension_numbers<[1], [0], [0], [1], [0, 0, 1, 1], [], []>} : vector<8x128xf32>, vector<128x128xf32>, vector<8x128xf32> -> vector<8x128xf32>
      %c0_56 = arith.constant 0 : index
      %c0_57 = arith.constant 0 : index
      %71 = vector.load %arg8[%c0_56, %c0_57] : memref<1x128xf32, #tpu.memory_space<vmem>>, vector<1x128xf32>
      %72 = vector.broadcast %71 : vector<1x128xf32> to vector<8x128xf32>
      %73 = arith.addf %70, %72 : vector<8x128xf32>
      %cst_58 = arith.constant dense<0xFF800000> : vector<8xf32>
      %74 = vector.multi_reduction <maximumf>, %73, %cst_58 [1] : vector<8x128xf32> to vector<8xf32>
      %75 = vector.shape_cast %74 : vector<8xf32> to vector<8x1xf32>
      %76 = vector.broadcast %75 : vector<8x1xf32> to vector<8x128xf32>
      %77 = arith.subf %73, %76 : vector<8x128xf32>
      %78 = math.exp %77 : vector<8x128xf32>
      %cst_59 = arith.constant dense<0.000000e+00> : vector<8xf32>
      %79 = vector.multi_reduction <add>, %78, %cst_59 [1] : vector<8x128xf32> to vector<8xf32>
      %80 = vector.shape_cast %79 : vector<8xf32> to vector<8x1xf32>
      %81 = math.log %80 : vector<8x1xf32>
      %82 = vector.broadcast %81 : vector<8x1xf32> to vector<8x128xf32>
      %83 = arith.subf %77, %82 : vector<8x128xf32>
      %c3_60 = arith.constant 3 : index
      %c0_61 = arith.constant 0 : index
      %c0_62 = arith.constant 0 : index
      %84 = vector.load %arg9[%c3_60, %c0_61, %c0_62] : memref<4x8x128xf32, #tpu.memory_space<vmem>>, vector<1x8x128xf32>
      %85 = vector.shape_cast %84 : vector<1x8x128xf32> to vector<8x128xf32>
      %86 = vector.shape_cast %83 : vector<8x128xf32> to vector<1x8x128xf32>
      tpu.vector_store %arg9[%c3_60, %c0_61, %c0_62], %86 {strides = array<i32>} : memref<4x8x128xf32, #tpu.memory_space<vmem>>, vector<1x8x128xf32>,
      %c0_63 = arith.constant 0 : index
      %c0_64 = arith.constant 0 : index
      %c0_65 = arith.constant 0 : index
      %87 = vector.load %arg10[%c0_63, %c0_64, %c0_65] : memref<3x8x128xf32, #tpu.memory_space<vmem>>, vector<1x8x128xf32>
      %88 = vector.shape_cast %87 : vector<1x8x128xf32> to vector<8x128xf32>
      %89 = vector.shape_cast %42 : vector<8x128xf32> to vector<1x8x128xf32>
      tpu.vector_store %arg10[%c0_63, %c0_64, %c0_65], %89 {strides = array<i32>} : memref<3x8x128xf32, #tpu.memory_space<vmem>>, vector<1x8x128xf32>,
      %c1_66 = arith.constant 1 : index
      %c0_67 = arith.constant 0 : index
      %c0_68 = arith.constant 0 : index
      %90 = vector.load %arg10[%c1_66, %c0_67, %c0_68] : memref<3x8x128xf32, #tpu.memory_space<vmem>>, vector<1x8x128xf32>
      %91 = vector.shape_cast %90 : vector<1x8x128xf32> to vector<8x128xf32>
      %92 = vector.shape_cast %55 : vector<8x128xf32> to vector<1x8x128xf32>
      tpu.vector_store %arg10[%c1_66, %c0_67, %c0_68], %92 {strides = array<i32>} : memref<3x8x128xf32, #tpu.memory_space<vmem>>, vector<1x8x128xf32>,
      %c2_69 = arith.constant 2 : index
      %c0_70 = arith.constant 0 : index
      %c0_71 = arith.constant 0 : index
      %93 = vector.load %arg10[%c2_69, %c0_70, %c0_71] : memref<3x8x128xf32, #tpu.memory_space<vmem>>, vector<1x8x128xf32>
      %94 = vector.shape_cast %93 : vector<1x8x128xf32> to vector<8x128xf32>
      %95 = vector.shape_cast %68 : vector<8x128xf32> to vector<1x8x128xf32>
      tpu.vector_store %arg10[%c2_69, %c0_70, %c0_71], %95 {strides = array<i32>} : memref<3x8x128xf32, #tpu.memory_space<vmem>>, vector<1x8x128xf32>,
    } else {
    }
    return
  }
  func.func @transform_0(%arg0: i32, %arg1: i32) -> (i32, i32, i32) {
    %c0_i32 = arith.constant 0 : i32
    %c0_i32_0 = arith.constant 0 : i32
    return %arg1, %arg0, %c0_i32 : i32, i32, i32
  }
  func.func @transform_1(%arg0: i32, %arg1: i32) -> (i32, i32, i32) {
    %c0_i32 = arith.constant 0 : i32
    %c0_i32_0 = arith.constant 0 : i32
    %c0_i32_1 = arith.constant 0 : i32
    return %c0_i32, %arg0, %c0_i32_0 : i32, i32, i32
  }
  func.func @transform_2(%arg0: i32, %arg1: i32) -> (i32, i32) {
    %c0_i32 = arith.constant 0 : i32
    %c0_i32_0 = arith.constant 0 : i32
    %c0_i32_1 = arith.constant 0 : i32
    return %c0_i32, %c0_i32_0 : i32, i32
  }
  func.func @transform_3(%arg0: i32, %arg1: i32) -> (i32, i32, i32) {
    %c0_i32 = arith.constant 0 : i32
    %c0_i32_0 = arith.constant 0 : i32
    %c0_i32_1 = arith.constant 0 : i32
    %c0_i32_2 = arith.constant 0 : i32
    return %c0_i32, %c0_i32_0, %c0_i32_1 : i32, i32, i32
  }
  func.func @transform_4(%arg0: i32, %arg1: i32) -> (i32, i32, i32) {
    %c0_i32 = arith.constant 0 : i32
    %c0_i32_0 = arith.constant 0 : i32
    %c0_i32_1 = arith.constant 0 : i32
    %c0_i32_2 = arith.constant 0 : i32
    return %c0_i32, %c0_i32_0, %c0_i32_1 : i32, i32, i32
  }
  func.func @transform_5(%arg0: i32, %arg1: i32) -> (i32, i32) {
    %c0_i32 = arith.constant 0 : i32
    %c0_i32_0 = arith.constant 0 : i32
    %c0_i32_1 = arith.constant 0 : i32
    return %c0_i32, %c0_i32_0 : i32, i32
  }
  func.func @transform_6(%arg0: i32, %arg1: i32) -> (i32, i32) {
    %c0_i32 = arith.constant 0 : i32
    %c0_i32_0 = arith.constant 0 : i32
    %c0_i32_1 = arith.constant 0 : i32
    return %c0_i32, %c0_i32_0 : i32, i32
  }
  func.func @transform_7(%arg0: i32, %arg1: i32) -> (i32, i32, i32) {
    %c0_i32 = arith.constant 0 : i32
    %c0_i32_0 = arith.constant 0 : i32
    return %arg1, %arg0, %c0_i32 : i32, i32, i32
  }
  func.func @transform_8(%arg0: i32, %arg1: i32) -> (i32, i32, i32) {
    %c0_i32 = arith.constant 0 : i32
    %c0_i32_0 = arith.constant 0 : i32
    %c0_i32_1 = arith.constant 0 : i32
    return %c0_i32, %arg0, %c0_i32_0 : i32, i32, i32
  }
}

</mosaic_0001>

<bundles_post_ra>
// kernel: tpu_custom_call.1
= control target key start
LH: loop header
LB: loop body
LE: loop exit
PB: predicated region body
PF: predicated region fallthrough
CT: control target
= control target key end

     0   :  { %s2616_s0 = inlined_call_operand.hbm [shape: f32[12,8,128], index: 0, kind: input, shape index: {}]   ;;  %s2617_s1 = inlined_call_operand.hbm [shape: f32[3,8,128], index: 1, kind: input, shape index: {}, may-alias: {1,8}]   ;;  %s2618_s2 = inlined_call_operand.hbm [shape: f32[128,128], index: 2, kind: input, shape index: {}]   ;;  %s2619_s3 = inlined_call_operand.hbm [shape: f32[5,128,128], index: 3, kind: input, shape index: {}]   ;;  %s2620_s4 = inlined_call_operand.vmem [shape: f32[3,1,128], index: 4, kind: input, shape index: {}]   ;;  %s2621_s5 = inlined_call_operand.hbm [shape: f32[128,128], index: 5, kind: input, shape index: {}]   ;;  %s2622_s6 = inlined_call_operand.vmem [shape: f32[1,128], index: 6, kind: input, shape index: {}]   ;;  %s2623_s7 = inlined_call_operand.hbm [shape: f32[12,8,128], index: 7, kind: output, shape index: {0}]   ;;  %s2624_s8 = inlined_call_operand.hbm [shape: f32[3,8,128], index: 8, kind: output, shape index: {1}, may-alias: {1,8}]  }
   0x1   :  { %2630 = sst [smem:[#allocation21_spill]] %s2617_s1 }
   0x2   :  { %2631 = sst [smem:[#allocation22_spill]] %s2618_s2 }
   0x3   :  { %2632 = sst [smem:[#allocation23_spill]] %s2619_s3 }
   0x4   :  { %2633 = sst [smem:[#allocation24_spill]] %s2621_s5 }
   0x5   :  { %14 = vsyncpa [#allocation3], 0 }
   0x6   :  { %16 = vsyncpa [#allocation3 + $0x1], 0 }
   0x7   :  { %17 = vsyncpa [#allocation6], 0 }
   0x8   :  { %18 = vsyncpa [#allocation9], 0 }
   0x9   :  { %19 = vsyncpa [#allocation4], 0 }
   0xa   :  { %21 = vsyncpa [#allocation4 + $0x1], 0 }
   0xb   :  { %22 = vsyncpa [#allocation13], 0  ;;  %s2351_s27 = smov 0   ;;  %s2353_s28 = smov 0  }
   0xc   :  { %s2355_s29 = smov 0   ;;  %s2357_s30 = smov 0  }
   0xd   :  { %s2359_s9 = smov 0   ;;  %s2361_s10 = smov 0  }
   0xe LB: > { %s2625_s11 = sadd.s32 4294967295, %s2295_s10   ;;  %s1831_s12 = sadd.s32 4294967294, %s2295_s10   ;;  %s2295_s10 = sphi %s2361_s10, %s28_s10   ;;  %s2291_s9 = sphi %s2359_s9, %s2656_s9   ;;  %s2287_s30 = sphi %s2357_s30, %s2655_s30   ;;  %s2283_s29 = sphi %s2355_s29, %s2654_s29   ;;  %s2279_s28 = sphi %s2353_s28, %s2653_s28   ;;  %s2275_s27 = sphi %s2351_s27, %s2652_s27  }
   0xf   : > { %p62_p0 = scmp.ne.s32.totalorder %s2279_s28, %s2275_s27  ;;  %p2387_p1 = scmp.eq.s32.totalorder %s2625_s11, 0 }
  0x10   : > { %p225_p2 = scmp.eq.s32.totalorder %s1831_s12, 2  ;;  %p1832_p4 = scmp.ge.s32.totalorder %s2295_s10, 1 }
  0x11   : > { %p2393_p3 = por %p2387_p1, %p62_p0  ;;  %p258_p6 = scmp.lt.s32.totalorder %s2295_s10, 4 }
  0x12   : > { %p2398_p5 = por %p225_p2, %p62_p0  ;;  %s2638_s1 = sld [smem:[#allocation21_spill]] }
  0x13   : > { %p2406_p7 = pnand %p1832_p4, %p258_p6  ;;  %s2297_s20 = smov [#allocation5]  }
  0x14   : > { %s2636_s15 = scalar_select %p2398_p5, 1, 0 }
  0x15   : > { %p1901_p8 = pneg %p2406_p7  ;;  %s273_s21 = sshll.u32 %s2297_s20, 4  ;;  %s274_s21 = int_to_ptr.vmem [resolvable:$true] %s273_s21 }
  0x16   : > { %2637 = sst [smem:[#allocation19_spill]] %s2636_s15  ;;  %s2626_s26 = smov 128  }
  0x17   : > { %p2414_p9 = pnand %p1901_p8, %p2387_p1  ;;  %s2641_s3 = sld [smem:[#allocation23_spill]] }
  0x18   : > { %s271_s18 = sshll.u32 %s2638_s1, 4  ;;  %s2627_s12 = smov 8   ;;  %s272_s18 = int_to_ptr.hbm [resolvable:$true] %s271_s18 }
  0x19   : > { %1904 = dma.hbm_to_vmem [thread:$0]  (!%p2414_p9), %s272_s18, 384, %s274_s21, [#allocation6], %s2626_s26, %s2626_s26, %s2627_s12  }
  0x1a   : > { %s2300_s16 = smov [#allocation8]   ;;  %s2642_s2 = sld [smem:[#allocation22_spill]] }
  0x1b   : > { %s301_s17 = sshll.u32 %s2300_s16, 4  ;;  %s2643_s5 = sld [smem:[#allocation24_spill]]  ;;  %s302_s17 = int_to_ptr.vmem [resolvable:$true] %s301_s17 }
  0x1c   : > { %s2301_s16 = smov [#allocation7]   ;;  %s2302_s11 = smov [#allocation10]  }
  0x1d   : > { %s299_s25 = sshll.u32 %s2641_s3, 4  ;;  %s287_s1 = sshll.u32 %s2301_s16, 4  ;;  %s300_s25 = int_to_ptr.hbm [resolvable:$true] %s299_s25  ;;  %s288_s1 = int_to_ptr.vmem [resolvable:$true] %s287_s1 }
  0x1e   : > { %1910 = dma.hbm_to_vmem [thread:$0]  (!%p2414_p9), %s300_s25, 10240, %s302_s17, [#allocation9], %s2626_s26, %s2626_s26, %s2627_s12  }
  0x1f   : > { %s318_s20 = sshll.u32 %s2302_s11, 4  ;;  %s2644_s25 = sadd.s32 4294967295, %s2295_s10   ;;  %s319_s20 = int_to_ptr.vmem [resolvable:$true] %s318_s20 }
  0x20   : > { %s285_s23 = sshll.u32 %s2642_s2, 4  ;;  %p2449_p10 = scmp.eq.s32.totalorder %s2644_s25, 2  ;;  %s286_s23 = int_to_ptr.hbm [resolvable:$true] %s285_s23 }
  0x21   : > { %s316_s24 = sshll.u32 %s2643_s5, 4  ;;  %s37_s18 = sadd.s32 1, %s2291_s9  ;;  %s317_s24 = int_to_ptr.hbm [resolvable:$true] %s316_s24 }
  0x22   : > { %1907 = dma.hbm_to_vmem [thread:$0]  (!%p2414_p9), %s286_s23, 2048, %s288_s1, [#allocation6], %s2626_s26, %s2626_s26, %s2627_s12  }
  0x23   : > { %1913 = dma.hbm_to_vmem [thread:$0]  (!%p2414_p9), %s317_s24, 2048, %s319_s20, [#allocation9], %s2626_s26, %s2626_s26, %s2627_s12  }
  0x24   : > { %p38_p11 = scmp.ge.s32.totalorder %s37_s18, 3  ;;  %s49_s21 = sadd.s32 1, %s2283_s29 }
  0x25   : > { %p56_p12 = scmp.ne.s32.totalorder %s2283_s29, %s2279_s28  ;;  %p57_p13 = scmp.eq.s32.totalorder %s2295_s10, 0 }
  0x26   : > { %s2658_s18 = smov (%p38_p11, %s37_s18), 0  ;;  %p1926_p2 = scmp.lt.s32.totalorder %s2295_s10, 3 }
  0x27   : > { %2646 = sst [smem:[#allocation20_spill]] %s2658_s18  ;;  %p2462_p0 = por %p2449_p10, %p56_p12 }
  0x28   : > { %s44_s22 = ssub.s32 %s2291_s9, %s2658_s18  ;;  %s335_s23 = sand.u32 1, %s2283_s29  }
  0x29   : > { %p47_p4 = scmp.eq.s32.totalorder %s44_s22, 0  ;;  %p58_p6 = por %p57_p13, %p56_p12 }
  0x2a   : > { %s1838_s24 = sshll.u32 %s335_s23, 5  ;;  %s1875_s16 = sshll.u32 %s2291_s9, 5 }
  0x2b   : > { %s2472_s11 = scalar_select %p47_p4, %s2283_s29, %s49_s21  }
  0x2c   : > { %s345_s26 = scalar_lea.hbm %s2616_s0, %s1875_s16  ;;  %s339_s2 = scalar_lea.vmem [#allocation2], %s1838_s24 }
  0x2d   : > { %s346_s12 = sshll.u32 %s345_s26, 4  ;;  %s348_s3 = sshll.u32 %s339_s2, 4  ;;  %s347_s12 = int_to_ptr.hbm [resolvable:$true] %s346_s12  ;;  %s349_s3 = int_to_ptr.vmem [resolvable:$true] %s348_s3 }
  0x2e   : > { %p1915_p8 = pnand %p1926_p2, %p58_p6  ;;  %s336_s5 = scalar_lea.sflag [#allocation3], %s335_s23 }
  0x2f   : > { %s2648_s18 = smov 8   ;;  %s2649_s15 = smov 128  }
  0x30   : > { %1917 = dma.hbm_to_vmem [thread:$0]  (!%p1915_p8), %s347_s12, 512, %s349_s3, %s336_s5, %s2649_s15, %s2649_s15, %s2648_s18  }
  0x31   : > { %360 = sbr.rel (%p2406_p7) target bundleno = 3419 (0xd5b), region = 48  ;;  %s2485_s21 = sand.u32 (!%p2406_p7), 1, %s2279_s28  }
  0x32   : > { %s1842_s26 = sshll.u32 (!%p2406_p7), %s2485_s21, 5  ;;  %s363_s2 = scalar_lea.sflag (!%p2406_p7), [#allocation3], %s2485_s21 }
  0x33   : > { %s2489_s22 = scalar_lea.vmem (!%p2406_p7), [#allocation2], %s1842_s26 }
  0x36   : > { %2254 = dma.done.wait (%p2393_p3), %s363_s2, 512  }
  0x37   : > { %2256 = vsyncadd (%p2393_p3), %s363_s2, 4294966784 }
  0x38   : > { %2258 = dma.done.wait (%p2387_p1), [#allocation6], 2432  }
  0x39   : > { %2260 = vsyncadd (%p2387_p1), [#allocation6], 4294964864 }
  0x3a   : > { %2262 = dma.done.wait (%p2387_p1), [#allocation9], 12288  }
  0x3b   : > { %2264 = vsyncadd (%p2387_p1), [#allocation9], 4294955008  ;;  %s2503_s3 = scalar_lea.vmem [#allocation11], %s1842_s26  ;;  %p1848_p7 = scmp.ne.s32.totalorder %s2287_s30, 0 }
  0x3d   : > { %425 = sbr.rel (%p1848_p7) target bundleno = 70 (0x46), region = 72 }
  0x42   : > { %v426_v0 = vld [vmem:[#allocation5] sm:$0xff]  ;;  %v427_v1 = vld [vmem:[#allocation5 + $0x8] sm:$0xff]  ;;  %v428_v2 = vld [vmem:[#allocation5 + $0x10] sm:$0xff] }
  0x43   : > { %429 = vst [vmem:[#allocation12] sm:$0xff] %v426_v0 }
  0x44   : > { %430 = vst [vmem:[#allocation12 + $0x8] sm:$0xff] %v427_v1 }
  0x45   : > { %431 = vst [vmem:[#allocation12 + $0x10] sm:$0xff] %v428_v2 }
  0x46 PF: > { %s2507_s5 = sshll.u32 %s2287_s30, 2 }
  0x47   : > { %p1850_p3 = scmp.ge.s32.totalorder %s2507_s5, 10 }
  0x49   : > { %436 = sbr.rel (%p1850_p3) target bundleno = 902 (0x386), region = 76 }
  0x4e   : > { %v474_v3 = vld [vmem:[#allocation8 + $0x78] sm:$0xff]  ;;  %v473_v5 = vld [vmem:[#allocation8 + $0x70] sm:$0xff]  ;;  %v472_v7 = vld [vmem:[#allocation8 + $0x68] sm:$0xff] }
  0x4f   : > { %v458_v4 = vld [vmem:[#allocation7 + $0x78] sm:$0xff]  ;;  %475 = vmatpush.msra.mxu0 %v474_v3  ;;  %v457_v6 = vld [vmem:[#allocation7 + $0x70] sm:$0xff]  ;;  %v456_v8 = vld [vmem:[#allocation7 + $0x68] sm:$0xff] }
  0x50   : > { %495 = vmatpush.msra.mxu1 %v458_v4  ;;  %v471_v9 = vld [vmem:[#allocation8 + $0x60] sm:$0xff]  ;;  %v470_v11 = vld [vmem:[#allocation8 + $0x58] sm:$0xff]  ;;  %v469_v13 = vld [vmem:[#allocation8 + $0x50] sm:$0xff] }
  0x51   : > { %476 = vmatpush.msra.mxu0 %v473_v5  ;;  %v455_v10 = vld [vmem:[#allocation7 + $0x60] sm:$0xff]  ;;  %v454_v12 = vld [vmem:[#allocation7 + $0x58] sm:$0xff]  ;;  %v453_v14 = vld [vmem:[#allocation7 + $0x50] sm:$0xff] }
  0x52   : > { %496 = vmatpush.msra.mxu1 %v457_v6  ;;  %v468_v15 = vld [vmem:[#allocation8 + $0x48] sm:$0xff]  ;;  %v467_v17 = vld [vmem:[#allocation8 + $0x40] sm:$0xff]  ;;  %v554_v18 = vld [vmem:[#allocation8 + $0x178] sm:$0xff] }
  0x53   : > { %477 = vmatpush.msra.mxu0 %v472_v7  ;;  %v452_v16 = vld [vmem:[#allocation7 + $0x48] sm:$0xff]  ;;  %v537_v19 = vld [vmem:[#allocation8 + $0xf8] sm:$0xff]  ;;  %v451_v20 = vld [vmem:[#allocation7 + $0x40] sm:$0xff]  ;;  %555 = vmatpush.msra.mxu2 %v554_v18 }
  0x54   : > { %497 = vmatpush.msra.mxu1 %v456_v8  ;;  %575 = vmatpush.msra.mxu3 %v537_v19  ;;  %v553_v21 = vld [vmem:[#allocation8 + $0x170] sm:$0xff]  ;;  %v552_v23 = vld [vmem:[#allocation8 + $0x168] sm:$0xff]  ;;  %v466_v25 = vld [vmem:[#allocation8 + $0x38] sm:$0xff] }
  0x55   : > { %478 = vmatpush.msra.mxu0 %v471_v9  ;;  %v536_v22 = vld [vmem:[#allocation8 + $0xf0] sm:$0xff]  ;;  %v535_v24 = vld [vmem:[#allocation8 + $0xe8] sm:$0xff]  ;;  %v450_v26 = vld [vmem:[#allocation7 + $0x38] sm:$0xff]  ;;  %556 = vmatpush.msra.mxu2 %v553_v21 }
  0x56   : > { %498 = vmatpush.msra.mxu1 %v455_v10  ;;  %576 = vmatpush.msra.mxu3 %v536_v22  ;;  %v551_v27 = vld [vmem:[#allocation8 + $0x160] sm:$0xff]  ;;  %v465_v29 = vld [vmem:[#allocation8 + $0x30] sm:$0xff]  ;;  %v464_v31 = vld [vmem:[#allocation8 + $0x28] sm:$0xff] }
  0x57   : > { %479 = vmatpush.msra.mxu0 %v470_v11  ;;  %v534_v28 = vld [vmem:[#allocation8 + $0xe0] sm:$0xff]  ;;  %v449_v30 = vld [vmem:[#allocation7 + $0x30] sm:$0xff]  ;;  %557 = vmatpush.msra.mxu2 %v552_v23  ;;  %v550_v32 = vld [vmem:[#allocation8 + $0x158] sm:$0xff] }
  0x58   : > { %499 = vmatpush.msra.mxu1 %v454_v12  ;;  %577 = vmatpush.msra.mxu3 %v535_v24  ;;  %v533_v33 = vld [vmem:[#allocation8 + $0xd8] sm:$0xff]  ;;  %v448_v34 = vld [vmem:[#allocation7 + $0x28] sm:$0xff]  ;;  %v463_v35 = vld [vmem:[#allocation8 + $0x20] sm:$0xff] }
  0x59   : > { %480 = vmatpush.msra.mxu0 %v469_v13  ;;  %558 = vmatpush.msra.mxu2 %v551_v27  ;;  %v549_v36 = vld [vmem:[#allocation8 + $0x150] sm:$0xff]  ;;  %v447_v38 = vld [vmem:[#allocation7 + $0x20] sm:$0xff]  ;;  %v548_v39 = vld [vmem:[#allocation8 + $0x148] sm:$0xff] }
  0x5a   : > { %500 = vmatpush.msra.mxu1 %v453_v14  ;;  %578 = vmatpush.msra.mxu3 %v534_v28  ;;  %v532_v37 = vld [vmem:[#allocation8 + $0xd0] sm:$0xff]  ;;  %v531_v40 = vld [vmem:[#allocation8 + $0xc8] sm:$0xff]  ;;  %v462_v41 = vld [vmem:[#allocation8 + $0x18] sm:$0xff] }
  0x5b   : > { %481 = vmatpush.msra.mxu0 %v468_v15  ;;  %559 = vmatpush.msra.mxu2 %v550_v32  ;;  %v446_v42 = vld [vmem:[#allocation7 + $0x18] sm:$0xff]  ;;  %v547_v43 = vld [vmem:[#allocation8 + $0x140] sm:$0xff]  ;;  %v461_v45 = vld [vmem:[#allocation8 + $0x10] sm:$0xff] }
  0x5c   : > { %501 = vmatpush.msra.mxu1 %v452_v16  ;;  %579 = vmatpush.msra.mxu3 %v533_v33  ;;  %v530_v44 = vld [vmem:[#allocation8 + $0xc0] sm:$0xff]  ;;  %v445_v46 = vld [vmem:[#allocation7 + $0x10] sm:$0xff]  ;;  %v546_v47 = vld [vmem:[#allocation8 + $0x138] sm:$0xff] }
  0x5d   : > { %482 = vmatpush.msra.mxu0 %v467_v17  ;;  %560 = vmatpush.msra.mxu2 %v549_v36  ;;  %v529_v48 = vld [vmem:[#allocation8 + $0xb8] sm:$0xff]  ;;  %v460_v49 = vld [vmem:[#allocation8 + $0x8] sm:$0xff]  ;;  %v545_v51 = vld [vmem:[#allocation8 + $0x130] sm:$0xff] }
  0x5e   : > { %502 = vmatpush.msra.mxu1 %v451_v20  ;;  %580 = vmatpush.msra.mxu3 %v532_v37  ;;  %v444_v50 = vld [vmem:[#allocation7 + $0x8] sm:$0xff]  ;;  %v528_v52 = vld [vmem:[#allocation8 + $0xb0] sm:$0xff]  ;;  %v459_v53 = vld [vmem:[#allocation8] sm:$0xff] }
  0x5f   : > { %483 = vmatpush.msra.mxu0 %v466_v25  ;;  %561 = vmatpush.msra.mxu2 %v548_v39  ;;  %v443_v54 = vld [vmem:[#allocation7] sm:$0xff]  ;;  %v437_v56 = vld [vmem:[%s2489_s22] sm:$0xff]  ;;  %v542_v61 = vld [vmem:[#allocation8 + $0x118] sm:$0xff] }
  0x60   : > { %503 = vmatpush.msra.mxu1 %v450_v26  ;;  %581 = vmatpush.msra.mxu3 %v531_v40  ;;  %v438_v55 = vld [vmem:[#allocation12] sm:$0xff]  ;;  %v544_v57 = vld [vmem:[#allocation8 + $0x128] sm:$0xff]  ;;  %v525_v62 = vld [vmem:[#allocation8 + $0x98] sm:$0xff] }
  0x61   : > { %484 = vmatpush.msra.mxu0 %v465_v29  ;;  %562 = vmatpush.msra.mxu2 %v547_v43  ;;  %v527_v58 = vld [vmem:[#allocation8 + $0xa8] sm:$0xff]  ;;  %v543_v59 = vld [vmem:[#allocation8 + $0x120] sm:$0xff]  ;;  %v541_v63 = vld [vmem:[#allocation8 + $0x110] sm:$0xff] }
  0x62   : > { %504 = vmatpush.msra.mxu1 %v449_v30  ;;  %582 = vmatpush.msra.mxu3 %v530_v44  ;;  %v526_v60 = vld [vmem:[#allocation8 + $0xa0] sm:$0xff]  ;;  %v524_v0 = vld [vmem:[#allocation8 + $0x90] sm:$0xff]  ;;  %v540_v1 = vld [vmem:[#allocation8 + $0x108] sm:$0xff] }
  0x63   : > { %485 = vmatpush.msra.mxu0 %v464_v31  ;;  %563 = vmatpush.msra.mxu2 %v546_v47  ;;  %v523_v2 = vld [vmem:[#allocation8 + $0x88] sm:$0xff]  ;;  %v539_v3 = vld [vmem:[#allocation8 + $0x100] sm:$0xff]  ;;  %v635_v6 = vld [vmem:[#allocation8 + $0x278] sm:$0xff] }
  0x64   : > { %505 = vmatpush.msra.mxu1 %v448_v34  ;;  %583 = vmatpush.msra.mxu3 %v529_v48  ;;  %v522_v4 = vld [vmem:[#allocation8 + $0x80] sm:$0xff]  ;;  %v440_v5 = vld [vmem:[#allocation12 + $0x8] sm:$0xff]  ;;  %v618_v7 = vld [vmem:[#allocation8 + $0x1f8] sm:$0xff] }
  0x65   : > { %486 = vmatpush.msra.mxu0 %v463_v35  ;;  %564 = vmatpush.msra.mxu2 %v545_v51  ;;  %v634_v8 = vld [vmem:[#allocation8 + $0x270] sm:$0xff]  ;;  %v633_v10 = vld [vmem:[#allocation8 + $0x268] sm:$0xff]  ;;  %v632_v12 = vld [vmem:[#allocation8 + $0x260] sm:$0xff] }
  0x66   : > { %506 = vmatpush.msra.mxu1 %v447_v38  ;;  %584 = vmatpush.msra.mxu3 %v528_v52  ;;  %v617_v9 = vld [vmem:[#allocation8 + $0x1f0] sm:$0xff]  ;;  %v616_v11 = vld [vmem:[#allocation8 + $0x1e8] sm:$0xff]  ;;  %v615_v13 = vld [vmem:[#allocation8 + $0x1e0] sm:$0xff] }
  0x67   : > { %487 = vmatpush.msra.mxu0 %v462_v41  ;;  %565 = vmatpush.msra.mxu2 %v544_v57  ;;  %v631_v14 = vld [vmem:[#allocation8 + $0x258] sm:$0xff]  ;;  %v630_v16 = vld [vmem:[#allocation8 + $0x250] sm:$0xff]  ;;  %v629_v18 = vld [vmem:[#allocation8 + $0x248] sm:$0xff] }
  0x68   : > { %507 = vmatpush.msra.mxu1 %v446_v42  ;;  %585 = vmatpush.msra.mxu3 %v527_v58  ;;  %v614_v15 = vld [vmem:[#allocation8 + $0x1d8] sm:$0xff]  ;;  %v613_v17 = vld [vmem:[#allocation8 + $0x1d0] sm:$0xff]  ;;  %v612_v19 = vld [vmem:[#allocation8 + $0x1c8] sm:$0xff] }
  0x69   : > { %488 = vmatpush.msra.mxu0 %v461_v45  ;;  %566 = vmatpush.msra.mxu2 %v543_v59  ;;  %v628_v20 = vld [vmem:[#allocation8 + $0x240] sm:$0xff]  ;;  %v627_v22 = vld [vmem:[#allocation8 + $0x238] sm:$0xff]  ;;  %v626_v24 = vld [vmem:[#allocation8 + $0x230] sm:$0xff] }
  0x6a   : > { %508 = vmatpush.msra.mxu1 %v445_v46  ;;  %586 = vmatpush.msra.mxu3 %v526_v60  ;;  %v611_v21 = vld [vmem:[#allocation8 + $0x1c0] sm:$0xff]  ;;  %v610_v23 = vld [vmem:[#allocation8 + $0x1b8] sm:$0xff]  ;;  %v609_v25 = vld [vmem:[#allocation8 + $0x1b0] sm:$0xff] }
  0x6b   : > { %489 = vmatpush.msra.mxu0 %v460_v49  ;;  %567 = vmatpush.msra.mxu2 %v542_v61  ;;  %v625_v26 = vld [vmem:[#allocation8 + $0x228] sm:$0xff]  ;;  %v624_v28 = vld [vmem:[#allocation8 + $0x220] sm:$0xff]  ;;  %v623_v36 = vld [vmem:[#allocation8 + $0x218] sm:$0xff] }
  0x6c   : > { %509 = vmatpush.msra.mxu1 %v444_v50  ;;  %587 = vmatpush.msra.mxu3 %v525_v62  ;;  %v608_v27 = vld [vmem:[#allocation8 + $0x1a8] sm:$0xff]  ;;  %v607_v29 = vld [vmem:[#allocation8 + $0x1a0] sm:$0xff]  ;;  %v606_v37 = vld [vmem:[#allocation8 + $0x198] sm:$0xff] }
  0x6d   : > { %490 = vmatpush.msra.mxu0 %v459_v53  ;;  %568 = vmatpush.msra.mxu2 %v541_v63  ;;  %v1991_v30 = vld [vmem:[%s2620_s4] ss:$0 sm:$0xff]  ;;  %v622_v38 = vld [vmem:[#allocation8 + $0x210] sm:$0xff]  ;;  %v620_v42 = vld [vmem:[#allocation8 + $0x200] sm:$0xff] }
  0x6e   : > { %510 = vmatpush.msra.mxu1 %v443_v54  ;;  %491 = vmatmul.f32.vlgmr.msra.gmra.mxu0 %v438_v55  ;;  %v605_v39 = vld [vmem:[#allocation8 + $0x190] sm:$0xff]  ;;  %v621_v40 = vld [vmem:[#allocation8 + $0x208] sm:$0xff]  ;;  %v603_v43 = vld [vmem:[#allocation8 + $0x180] sm:$0xff] }
  0x6f   : > { %511 = vmatmul.f32.vlgmr.msra.gmra.mxu1 %v437_v56  ;;  %588 = vmatpush.msra.mxu3 %v524_v0  ;;  %v604_v41 = vld [vmem:[#allocation8 + $0x188] sm:$0xff]  ;;  %v442_v44 = vld [vmem:[#allocation12 + $0x10] sm:$0xff]  ;;  %v698_v45 = vld [vmem:[#allocation10 + $0x78] sm:$0xff] }
  0x70   : > { %569 = vmatpush.msra.mxu2 %v540_v1  ;;  %636 = vmatpush.msrb.mxu0 %v635_v6  ;;  %v697_v46 = vld [vmem:[#allocation10 + $0x70] sm:$0xff]  ;;  %v696_v47 = vld [vmem:[#allocation10 + $0x68] sm:$0xff]  ;;  %v695_v48 = vld [vmem:[#allocation10 + $0x60] sm:$0xff] }
  0x71   : > { %589 = vmatpush.msra.mxu3 %v523_v2  ;;  %656 = vmatpush.msrb.mxu1 %v618_v7  ;;  %v694_v49 = vld [vmem:[#allocation10 + $0x58] sm:$0xff]  ;;  %v693_v50 = vld [vmem:[#allocation10 + $0x50] sm:$0xff]  ;;  %v692_v51 = vld [vmem:[#allocation10 + $0x48] sm:$0xff] }
  0x72   : > { %570 = vmatpush.msra.mxu2 %v539_v3  ;;  %637 = vmatpush.msrb.mxu0 %v634_v8  ;;  %v691_v52 = vld [vmem:[#allocation10 + $0x40] sm:$0xff]  ;;  %v690_v53 = vld [vmem:[#allocation10 + $0x38] sm:$0xff]  ;;  %v689_v54 = vld [vmem:[#allocation10 + $0x30] sm:$0xff] }
  0x73   : > { %590 = vmatpush.msra.mxu3 %v522_v4  ;;  %571 = vmatmul.f32.vlgmr.msra.gmra.mxu2 %v440_v5  ;;  %v688_v55 = vld [vmem:[#allocation10 + $0x28] sm:$0xff]  ;;  %v687_v56 = vld [vmem:[#allocation10 + $0x20] sm:$0xff]  ;;  %v686_v63 = vld [vmem:[#allocation10 + $0x18] sm:$0xff] }
  0x74   : > { %657 = vmatpush.msrb.mxu1 %v617_v9  ;;  %638 = vmatpush.msrb.mxu0 %v633_v10  ;;  %v1992_v58 = vld [vmem:[%s2620_s4 + $0x1] ss:$0 sm:$0xff]  ;;  %v685_v0 = vld [vmem:[#allocation10 + $0x10] sm:$0xff]  ;;  %v683_v2 = vld [vmem:[#allocation10] sm:$0xff] }
  0x75   : > { %703 = vmatpush.msrb.mxu2 %v698_v45  ;;  %v684_v1 = vld [vmem:[#allocation10 + $0x8] sm:$0xff] }
  0x76   : > { %658 = vmatpush.msrb.mxu1 %v616_v11  ;;  %639 = vmatpush.msrb.mxu0 %v632_v12  ;;  %v1993_v4 = vld [vmem:[%s2620_s4 + $0x2] ss:$0 sm:$0xff]  ;;  %v1994_v9 = vld [vmem:[%s2622_s6] ss:$0 sm:$0xff] }
  0x77   : > { %704 = vmatpush.msrb.mxu2 %v697_v46 }
  0x78   : > { %659 = vmatpush.msrb.mxu1 %v615_v13  ;;  %640 = vmatpush.msrb.mxu0 %v631_v14 }
  0x79   : > { %705 = vmatpush.msrb.mxu2 %v696_v47 }
  0x7a   : > { %660 = vmatpush.msrb.mxu1 %v614_v15  ;;  %641 = vmatpush.msrb.mxu0 %v630_v16 }
  0x7b   : > { %706 = vmatpush.msrb.mxu2 %v695_v48 }
  0x7c   : > { %661 = vmatpush.msrb.mxu1 %v613_v17  ;;  %642 = vmatpush.msrb.mxu0 %v629_v18 }
  0x7d   : > { %707 = vmatpush.msrb.mxu2 %v694_v49 }
  0x7e   : > { %662 = vmatpush.msrb.mxu1 %v612_v19  ;;  %643 = vmatpush.msrb.mxu0 %v628_v20 }
  0x7f   : > { %708 = vmatpush.msrb.mxu2 %v693_v50 }
  0x80   : > { %663 = vmatpush.msrb.mxu1 %v611_v21  ;;  %644 = vmatpush.msrb.mxu0 %v627_v22 }
  0x81   : > { %709 = vmatpush.msrb.mxu2 %v692_v51 }
  0x82   : > { %664 = vmatpush.msrb.mxu1 %v610_v23  ;;  %645 = vmatpush.msrb.mxu0 %v626_v24 }
  0x83   : > { %710 = vmatpush.msrb.mxu2 %v691_v52 }
  0x84   : > { %665 = vmatpush.msrb.mxu1 %v609_v25  ;;  %646 = vmatpush.msrb.mxu0 %v625_v26 }
  0x85   : > { %711 = vmatpush.msrb.mxu2 %v690_v53 }
  0x86   : > { %666 = vmatpush.msrb.mxu1 %v608_v27  ;;  %647 = vmatpush.msrb.mxu0 %v624_v28 }
  0x87   : > { %712 = vmatpush.msrb.mxu2 %v689_v54 }
  0x88   : > { %667 = vmatpush.msrb.mxu1 %v607_v29  ;;  %648 = vmatpush.msrb.mxu0 %v623_v36 }
  0x89   : > { %713 = vmatpush.msrb.mxu2 %v688_v55 }
  0x8a   : > { %668 = vmatpush.msrb.mxu1 %v606_v37  ;;  %649 = vmatpush.msrb.mxu0 %v622_v38 }
  0x8b   : > { %714 = vmatpush.msrb.mxu2 %v687_v56 }
  0x8c   : > { %669 = vmatpush.msrb.mxu1 %v605_v39  ;;  %650 = vmatpush.msrb.mxu0 %v621_v40 }
  0x8d   : > { %715 = vmatpush.msrb.mxu2 %v686_v63 }
  0x8e   : > { %670 = vmatpush.msrb.mxu1 %v604_v41  ;;  %651 = vmatpush.msrb.mxu0 %v620_v42 }
  0x8f   : > { %652 = vmatmul.f32.vlgmr.msrb.gmra.mxu0 %v442_v44  ;;  %716 = vmatpush.msrb.mxu2 %v685_v0 }
  0x90   : > { %671 = vmatpush.msrb.mxu1 %v603_v43 }
  0x91   : > { %717 = vmatpush.msrb.mxu2 %v684_v1 }
  0x93   : > { %718 = vmatpush.msrb.mxu2 %v683_v2 }
  0xeb   : > { %v492_v31 = vpop.f32.mrf.mxu0 }
  0xec   : > { %v512_v32 = vpop.f32.mrf.mxu1 }
  0xed   : > { %v513_v33 = vadd.f32 %v512_v32, %v492_v31 }
  0xef   : > { %v519_v34 = vadd.f32 %v1991_v30, %v513_v33 }
  0xf1   : > { %v520_v35 = vmax.f32 %v519_v34, 0.0 }
  0xf3   : > { %591 = vmatmul.f32.vlgmr.msra.gmra.mxu3 %v520_v35  ;;  %734 = vst [vmem:[#allocation12] sm:$0xff] %v520_v35 }
  0xf6   : > { %v572_v57 = vpop.f32.mrf.mxu2 }
 0x10c   : > { %v653_v3 = vpop.f32.mrf.mxu0 }
 0x176   : > { %v592_v59 = vpop.f32.mrf.mxu3 }
 0x177   : > { %v593_v60 = vadd.f32 %v592_v59, %v572_v57 }
 0x179   : > { %v600_v61 = vadd.f32 %v1992_v58, %v593_v60 }
 0x17b   : > { %v601_v62 = vmax.f32 %v600_v61, 0.0 }
 0x17d   : > { %735 = vst [vmem:[#allocation12 + $0x8] sm:$0xff] %v601_v62  ;;  %672 = vmatmul.f32.vlgmr.msrb.gmra.mxu1 %v601_v62 }
 0x1fa   : > { %v673_v5 = vpop.f32.mrf.mxu1 }
 0x1fb   : > { %v674_v6 = vadd.f32 %v673_v5, %v653_v3 }
 0x1fd   : > { %v681_v7 = vadd.f32 %v1993_v4, %v674_v6 }
 0x1ff   : > { %v682_v8 = vmax.f32 %v681_v7, 0.0 }
 0x201   : > { %736 = vst [vmem:[#allocation12 + $0x10] sm:$0xff] %v682_v8  ;;  %719 = vmatmul.f32.vlgmr.msrb.gmra.mxu2 %v682_v8 }
 0x284   : > { %v720_v10 = vpop.f32.mrf.mxu2 }
 0x285   : > { %v721_v11 = vadd.f32 %v1994_v9, %v720_v10 }
 0x287   : > { %723 = vmax.xlane.f32.xlu0 %v721_v11 }
 0x2fa   : > { %v724_v12 = vpop.xlane.xlu0 %723 }
 0x2fb   : > { %v725_v13 = vsub.f32 %v721_v11, %v724_v12 }
 0x2fd   : > { %v726_v14 = vmul.f32 1.442695, %v725_v13 }
 0x2ff   : > { %1995 = vpow2.f32 %v726_v14 }
 0x305   : > { %v1996_v15 = vpop.eup %1995 }
 0x306   : > { %728 = vadd.xlane.f32.xlu0 %v1996_v15 }
 0x379   : > { %v729_v16 = vpop.xlane.xlu0 %728 }
 0x37a   : > { %1997 = vlog2.f32 %v729_v16 }
 0x380   : > { %v1998_v17 = vpop.eup %1997 }
 0x381   : > { %v731_v18 = vmul.f32 0.6931472, %v1998_v17 }
 0x383   : > { %v732_v19 = vsub.f32 %v725_v13, %v731_v18 }
 0x385   : > { %733 = vst [vmem:[%s2503_s3] sm:$0xff] %v732_v19 }
 0x386 PF: > { %s737_s16 = sadd.s32 1, %s2507_s5 }
 0x387   : > { %p1853_p1 = scmp.ge.s32.totalorder %s737_s16, 10 }
 0x389   : > { %741 = sbr.rel (%p1853_p1) target bundleno = 1734 (0x6c6), region = 80 }
 0x38e   : > { %v780_v20 = vld [vmem:[#allocation8 + $0x78] sm:$0xff]  ;;  %v779_v22 = vld [vmem:[#allocation8 + $0x70] sm:$0xff]  ;;  %v778_v24 = vld [vmem:[#allocation8 + $0x68] sm:$0xff] }
 0x38f   : > { %v764_v21 = vld [vmem:[#allocation7 + $0x78] sm:$0xff]  ;;  %781 = vmatpush.msra.mxu0 %v780_v20  ;;  %v763_v23 = vld [vmem:[#allocation7 + $0x70] sm:$0xff]  ;;  %v762_v25 = vld [vmem:[#allocation7 + $0x68] sm:$0xff] }
 0x390   : > { %801 = vmatpush.msra.mxu1 %v764_v21  ;;  %v777_v26 = vld [vmem:[#allocation8 + $0x60] sm:$0xff]  ;;  %v776_v28 = vld [vmem:[#allocation8 + $0x58] sm:$0xff]  ;;  %v775_v30 = vld [vmem:[#allocation8 + $0x50] sm:$0xff] }
 0x391   : > { %782 = vmatpush.msra.mxu0 %v779_v22  ;;  %v761_v27 = vld [vmem:[#allocation7 + $0x60] sm:$0xff]  ;;  %v760_v29 = vld [vmem:[#allocation7 + $0x58] sm:$0xff]  ;;  %v759_v31 = vld [vmem:[#allocation7 + $0x50] sm:$0xff] }
 0x392   : > { %802 = vmatpush.msra.mxu1 %v763_v23  ;;  %v774_v32 = vld [vmem:[#allocation8 + $0x48] sm:$0xff]  ;;  %v773_v34 = vld [vmem:[#allocation8 + $0x40] sm:$0xff]  ;;  %v860_v35 = vld [vmem:[#allocation8 + $0x178] sm:$0xff] }
 0x393   : > { %783 = vmatpush.msra.mxu0 %v778_v24  ;;  %v758_v33 = vld [vmem:[#allocation7 + $0x48] sm:$0xff]  ;;  %v843_v36 = vld [vmem:[#allocation8 + $0xf8] sm:$0xff]  ;;  %v757_v37 = vld [vmem:[#allocation7 + $0x40] sm:$0xff]  ;;  %861 = vmatpush.msra.mxu2 %v860_v35 }
 0x394   : > { %803 = vmatpush.msra.mxu1 %v762_v25  ;;  %881 = vmatpush.msra.mxu3 %v843_v36  ;;  %v859_v38 = vld [vmem:[#allocation8 + $0x170] sm:$0xff]  ;;  %v858_v40 = vld [vmem:[#allocation8 + $0x168] sm:$0xff]  ;;  %v772_v42 = vld [vmem:[#allocation8 + $0x38] sm:$0xff] }
 0x395   : > { %784 = vmatpush.msra.mxu0 %v777_v26  ;;  %v842_v39 = vld [vmem:[#allocation8 + $0xf0] sm:$0xff]  ;;  %v841_v41 = vld [vmem:[#allocation8 + $0xe8] sm:$0xff]  ;;  %v756_v43 = vld [vmem:[#allocation7 + $0x38] sm:$0xff]  ;;  %862 = vmatpush.msra.mxu2 %v859_v38 }
 0x396   : > { %804 = vmatpush.msra.mxu1 %v761_v27  ;;  %882 = vmatpush.msra.mxu3 %v842_v39  ;;  %v857_v44 = vld [vmem:[#allocation8 + $0x160] sm:$0xff]  ;;  %v771_v46 = vld [vmem:[#allocation8 + $0x30] sm:$0xff]  ;;  %v770_v48 = vld [vmem:[#allocation8 + $0x28] sm:$0xff] }
 0x397   : > { %785 = vmatpush.msra.mxu0 %v776_v28  ;;  %v840_v45 = vld [vmem:[#allocation8 + $0xe0] sm:$0xff]  ;;  %v755_v47 = vld [vmem:[#allocation7 + $0x30] sm:$0xff]  ;;  %863 = vmatpush.msra.mxu2 %v858_v40  ;;  %v856_v49 = vld [vmem:[#allocation8 + $0x158] sm:$0xff] }
 0x398   : > { %805 = vmatpush.msra.mxu1 %v760_v29  ;;  %883 = vmatpush.msra.mxu3 %v841_v41  ;;  %v839_v50 = vld [vmem:[#allocation8 + $0xd8] sm:$0xff]  ;;  %v754_v51 = vld [vmem:[#allocation7 + $0x28] sm:$0xff]  ;;  %v769_v52 = vld [vmem:[#allocation8 + $0x20] sm:$0xff] }
 0x399   : > { %786 = vmatpush.msra.mxu0 %v775_v30  ;;  %864 = vmatpush.msra.mxu2 %v857_v44  ;;  %v855_v53 = vld [vmem:[#allocation8 + $0x150] sm:$0xff]  ;;  %v753_v55 = vld [vmem:[#allocation7 + $0x20] sm:$0xff]  ;;  %v854_v56 = vld [vmem:[#allocation8 + $0x148] sm:$0xff] }
 0x39a   : > { %806 = vmatpush.msra.mxu1 %v759_v31  ;;  %884 = vmatpush.msra.mxu3 %v840_v45  ;;  %v838_v54 = vld [vmem:[#allocation8 + $0xd0] sm:$0xff]  ;;  %v837_v57 = vld [vmem:[#allocation8 + $0xc8] sm:$0xff]  ;;  %v768_v58 = vld [vmem:[#allocation8 + $0x18] sm:$0xff] }
 0x39b   : > { %787 = vmatpush.msra.mxu0 %v774_v32  ;;  %865 = vmatpush.msra.mxu2 %v856_v49  ;;  %v752_v59 = vld [vmem:[#allocation7 + $0x18] sm:$0xff]  ;;  %v853_v60 = vld [vmem:[#allocation8 + $0x140] sm:$0xff]  ;;  %v767_v62 = vld [vmem:[#allocation8 + $0x10] sm:$0xff] }
 0x39c   : > { %807 = vmatpush.msra.mxu1 %v758_v33  ;;  %885 = vmatpush.msra.mxu3 %v839_v50  ;;  %v836_v61 = vld [vmem:[#allocation8 + $0xc0] sm:$0xff]  ;;  %v751_v63 = vld [vmem:[#allocation7 + $0x10] sm:$0xff]  ;;  %v852_v0 = vld [vmem:[#allocation8 + $0x138] sm:$0xff] }
 0x39d   : > { %788 = vmatpush.msra.mxu0 %v773_v34  ;;  %866 = vmatpush.msra.mxu2 %v855_v53  ;;  %v835_v1 = vld [vmem:[#allocation8 + $0xb8] sm:$0xff]  ;;  %v766_v2 = vld [vmem:[#allocation8 + $0x8] sm:$0xff]  ;;  %v851_v4 = vld [vmem:[#allocation8 + $0x130] sm:$0xff] }
 0x39e   : > { %808 = vmatpush.msra.mxu1 %v757_v37  ;;  %886 = vmatpush.msra.mxu3 %v838_v54  ;;  %v750_v3 = vld [vmem:[#allocation7 + $0x8] sm:$0xff]  ;;  %v834_v5 = vld [vmem:[#allocation8 + $0xb0] sm:$0xff]  ;;  %v765_v6 = vld [vmem:[#allocation8] sm:$0xff] }
 0x39f   : > { %789 = vmatpush.msra.mxu0 %v772_v42  ;;  %867 = vmatpush.msra.mxu2 %v854_v56  ;;  %v749_v7 = vld [vmem:[#allocation7] sm:$0xff]  ;;  %v1854_v9 = vld [vmem:[%s2489_s22 + $0x8] sm:$0xff]  ;;  %v850_v10 = vld [vmem:[#allocation8 + $0x128] sm:$0xff] }
 0x3a0   : > { %809 = vmatpush.msra.mxu1 %v756_v43  ;;  %887 = vmatpush.msra.mxu3 %v837_v57  ;;  %v744_v8 = vld [vmem:[#allocation12] sm:$0xff]  ;;  %v833_v11 = vld [vmem:[#allocation8 + $0xa8] sm:$0xff]  ;;  %v848_v14 = vld [vmem:[#allocation8 + $0x118] sm:$0xff] }
 0x3a1   : > { %790 = vmatpush.msra.mxu0 %v771_v46  ;;  %868 = vmatpush.msra.mxu2 %v853_v60  ;;  %v849_v12 = vld [vmem:[#allocation8 + $0x120] sm:$0xff]  ;;  %v831_v15 = vld [vmem:[#allocation8 + $0x98] sm:$0xff]  ;;  %v847_v16 = vld [vmem:[#allocation8 + $0x110] sm:$0xff] }
 0x3a2   : > { %810 = vmatpush.msra.mxu1 %v755_v47  ;;  %888 = vmatpush.msra.mxu3 %v836_v61  ;;  %v832_v13 = vld [vmem:[#allocation8 + $0xa0] sm:$0xff]  ;;  %v830_v17 = vld [vmem:[#allocation8 + $0x90] sm:$0xff]  ;;  %v846_v18 = vld [vmem:[#allocation8 + $0x108] sm:$0xff] }
 0x3a3   : > { %791 = vmatpush.msra.mxu0 %v770_v48  ;;  %869 = vmatpush.msra.mxu2 %v852_v0  ;;  %v829_v19 = vld [vmem:[#allocation8 + $0x88] sm:$0xff]  ;;  %v845_v20 = vld [vmem:[#allocation8 + $0x100] sm:$0xff]  ;;  %v941_v23 = vld [vmem:[#allocation8 + $0x278] sm:$0xff] }
 0x3a4   : > { %811 = vmatpush.msra.mxu1 %v754_v51  ;;  %889 = vmatpush.msra.mxu3 %v835_v1  ;;  %v828_v21 = vld [vmem:[#allocation8 + $0x80] sm:$0xff]  ;;  %v746_v22 = vld [vmem:[#allocation12 + $0x8] sm:$0xff]  ;;  %v924_v24 = vld [vmem:[#allocation8 + $0x1f8] sm:$0xff] }
 0x3a5   : > { %792 = vmatpush.msra.mxu0 %v769_v52  ;;  %870 = vmatpush.msra.mxu2 %v851_v4  ;;  %v940_v25 = vld [vmem:[#allocation8 + $0x270] sm:$0xff]  ;;  %v939_v27 = vld [vmem:[#allocation8 + $0x268] sm:$0xff]  ;;  %v938_v29 = vld [vmem:[#allocation8 + $0x260] sm:$0xff] }
 0x3a6   : > { %812 = vmatpush.msra.mxu1 %v753_v55  ;;  %890 = vmatpush.msra.mxu3 %v834_v5  ;;  %v923_v26 = vld [vmem:[#allocation8 + $0x1f0] sm:$0xff]  ;;  %v922_v28 = vld [vmem:[#allocation8 + $0x1e8] sm:$0xff]  ;;  %v921_v30 = vld [vmem:[#allocation8 + $0x1e0] sm:$0xff] }
 0x3a7   : > { %793 = vmatpush.msra.mxu0 %v768_v58  ;;  %871 = vmatpush.msra.mxu2 %v850_v10  ;;  %v937_v31 = vld [vmem:[#allocation8 + $0x258] sm:$0xff]  ;;  %v936_v33 = vld [vmem:[#allocation8 + $0x250] sm:$0xff]  ;;  %v935_v35 = vld [vmem:[#allocation8 + $0x248] sm:$0xff] }
 0x3a8   : > { %813 = vmatpush.msra.mxu1 %v752_v59  ;;  %891 = vmatpush.msra.mxu3 %v833_v11  ;;  %v920_v32 = vld [vmem:[#allocation8 + $0x1d8] sm:$0xff]  ;;  %v919_v34 = vld [vmem:[#allocation8 + $0x1d0] sm:$0xff]  ;;  %v918_v36 = vld [vmem:[#allocation8 + $0x1c8] sm:$0xff] }
 0x3a9   : > { %794 = vmatpush.msra.mxu0 %v767_v62  ;;  %872 = vmatpush.msra.mxu2 %v849_v12  ;;  %v934_v37 = vld [vmem:[#allocation8 + $0x240] sm:$0xff]  ;;  %v933_v39 = vld [vmem:[#allocation8 + $0x238] sm:$0xff]  ;;  %v932_v41 = vld [vmem:[#allocation8 + $0x230] sm:$0xff] }
 0x3aa   : > { %814 = vmatpush.msra.mxu1 %v751_v63  ;;  %892 = vmatpush.msra.mxu3 %v832_v13  ;;  %v917_v38 = vld [vmem:[#allocation8 + $0x1c0] sm:$0xff]  ;;  %v916_v40 = vld [vmem:[#allocation8 + $0x1b8] sm:$0xff]  ;;  %v915_v42 = vld [vmem:[#allocation8 + $0x1b0] sm:$0xff] }
 0x3ab   : > { %795 = vmatpush.msra.mxu0 %v766_v2  ;;  %873 = vmatpush.msra.mxu2 %v848_v14  ;;  %v931_v43 = vld [vmem:[#allocation8 + $0x228] sm:$0xff]  ;;  %v930_v45 = vld [vmem:[#allocation8 + $0x220] sm:$0xff]  ;;  %v929_v53 = vld [vmem:[#allocation8 + $0x218] sm:$0xff] }
 0x3ac   : > { %815 = vmatpush.msra.mxu1 %v750_v3  ;;  %893 = vmatpush.msra.mxu3 %v831_v15  ;;  %v914_v44 = vld [vmem:[#allocation8 + $0x1a8] sm:$0xff]  ;;  %v913_v46 = vld [vmem:[#allocation8 + $0x1a0] sm:$0xff]  ;;  %v912_v54 = vld [vmem:[#allocation8 + $0x198] sm:$0xff] }
 0x3ad   : > { %796 = vmatpush.msra.mxu0 %v765_v6  ;;  %874 = vmatpush.msra.mxu2 %v847_v16  ;;  %v1999_v47 = vld [vmem:[%s2620_s4] ss:$0 sm:$0xff]  ;;  %v928_v55 = vld [vmem:[#allocation8 + $0x210] sm:$0xff]  ;;  %v926_v59 = vld [vmem:[#allocation8 + $0x200] sm:$0xff] }
 0x3ae   : > { %816 = vmatpush.msra.mxu1 %v749_v7  ;;  %797 = vmatmul.f32.vlgmr.msra.gmra.mxu0 %v744_v8  ;;  %v911_v56 = vld [vmem:[#allocation8 + $0x190] sm:$0xff]  ;;  %v927_v57 = vld [vmem:[#allocation8 + $0x208] sm:$0xff]  ;;  %v909_v60 = vld [vmem:[#allocation8 + $0x180] sm:$0xff] }
 0x3af   : > { %817 = vmatmul.f32.vlgmr.msra.gmra.mxu1 %v1854_v9  ;;  %894 = vmatpush.msra.mxu3 %v830_v17  ;;  %v910_v58 = vld [vmem:[#allocation8 + $0x188] sm:$0xff]  ;;  %v748_v61 = vld [vmem:[#allocation12 + $0x10] sm:$0xff]  ;;  %v1004_v62 = vld [vmem:[#allocation10 + $0x78] sm:$0xff] }
 0x3b0   : > { %875 = vmatpush.msra.mxu2 %v846_v18  ;;  %942 = vmatpush.msrb.mxu0 %v941_v23  ;;  %v1003_v63 = vld [vmem:[#allocation10 + $0x70] sm:$0xff]  ;;  %v1002_v0 = vld [vmem:[#allocation10 + $0x68] sm:$0xff]  ;;  %v1001_v1 = vld [vmem:[#allocation10 + $0x60] sm:$0xff] }
 0x3b1   : > { %895 = vmatpush.msra.mxu3 %v829_v19  ;;  %962 = vmatpush.msrb.mxu1 %v924_v24  ;;  %v1000_v2 = vld [vmem:[#allocation10 + $0x58] sm:$0xff]  ;;  %v999_v3 = vld [vmem:[#allocation10 + $0x50] sm:$0xff]  ;;  %v998_v4 = vld [vmem:[#allocation10 + $0x48] sm:$0xff] }
 0x3b2   : > { %876 = vmatpush.msra.mxu2 %v845_v20  ;;  %943 = vmatpush.msrb.mxu0 %v940_v25  ;;  %v997_v5 = vld [vmem:[#allocation10 + $0x40] sm:$0xff]  ;;  %v996_v6 = vld [vmem:[#allocation10 + $0x38] sm:$0xff]  ;;  %v995_v7 = vld [vmem:[#allocation10 + $0x30] sm:$0xff] }
 0x3b3   : > { %896 = vmatpush.msra.mxu3 %v828_v21  ;;  %877 = vmatmul.f32.vlgmr.msra.gmra.mxu2 %v746_v22  ;;  %v994_v8 = vld [vmem:[#allocation10 + $0x28] sm:$0xff]  ;;  %v993_v9 = vld [vmem:[#allocation10 + $0x20] sm:$0xff]  ;;  %v992_v16 = vld [vmem:[#allocation10 + $0x18] sm:$0xff] }
 0x3b4   : > { %963 = vmatpush.msrb.mxu1 %v923_v26  ;;  %944 = vmatpush.msrb.mxu0 %v939_v27  ;;  %v2000_v11 = vld [vmem:[%s2620_s4 + $0x1] ss:$0 sm:$0xff]  ;;  %v991_v17 = vld [vmem:[#allocation10 + $0x10] sm:$0xff]  ;;  %v989_v19 = vld [vmem:[#allocation10] sm:$0xff] }
 0x3b5   : > { %1009 = vmatpush.msrb.mxu2 %v1004_v62  ;;  %v990_v18 = vld [vmem:[#allocation10 + $0x8] sm:$0xff] }
 0x3b6   : > { %964 = vmatpush.msrb.mxu1 %v922_v28  ;;  %945 = vmatpush.msrb.mxu0 %v938_v29  ;;  %v2001_v21 = vld [vmem:[%s2620_s4 + $0x2] ss:$0 sm:$0xff]  ;;  %v2002_v26 = vld [vmem:[%s2622_s6] ss:$0 sm:$0xff] }
 0x3b7   : > { %1010 = vmatpush.msrb.mxu2 %v1003_v63 }
 0x3b8   : > { %965 = vmatpush.msrb.mxu1 %v921_v30  ;;  %946 = vmatpush.msrb.mxu0 %v937_v31 }
 0x3b9   : > { %1011 = vmatpush.msrb.mxu2 %v1002_v0 }
 0x3ba   : > { %966 = vmatpush.msrb.mxu1 %v920_v32  ;;  %947 = vmatpush.msrb.mxu0 %v936_v33 }
 0x3bb   : > { %1012 = vmatpush.msrb.mxu2 %v1001_v1 }
 0x3bc   : > { %967 = vmatpush.msrb.mxu1 %v919_v34  ;;  %948 = vmatpush.msrb.mxu0 %v935_v35 }
 0x3bd   : > { %1013 = vmatpush.msrb.mxu2 %v1000_v2 }
 0x3be   : > { %968 = vmatpush.msrb.mxu1 %v918_v36  ;;  %949 = vmatpush.msrb.mxu0 %v934_v37 }
 0x3bf   : > { %1014 = vmatpush.msrb.mxu2 %v999_v3 }
 0x3c0   : > { %969 = vmatpush.msrb.mxu1 %v917_v38  ;;  %950 = vmatpush.msrb.mxu0 %v933_v39 }
 0x3c1   : > { %1015 = vmatpush.msrb.mxu2 %v998_v4 }
 0x3c2   : > { %970 = vmatpush.msrb.mxu1 %v916_v40  ;;  %951 = vmatpush.msrb.mxu0 %v932_v41 }
 0x3c3   : > { %1016 = vmatpush.msrb.mxu2 %v997_v5 }
 0x3c4   : > { %971 = vmatpush.msrb.mxu1 %v915_v42  ;;  %952 = vmatpush.msrb.mxu0 %v931_v43 }
 0x3c5   : > { %1017 = vmatpush.msrb.mxu2 %v996_v6 }
 0x3c6   : > { %972 = vmatpush.msrb.mxu1 %v914_v44  ;;  %953 = vmatpush.msrb.mxu0 %v930_v45 }
 0x3c7   : > { %1018 = vmatpush.msrb.mxu2 %v995_v7 }
 0x3c8   : > { %973 = vmatpush.msrb.mxu1 %v913_v46  ;;  %954 = vmatpush.msrb.mxu0 %v929_v53 }
 0x3c9   : > { %1019 = vmatpush.msrb.mxu2 %v994_v8 }
 0x3ca   : > { %974 = vmatpush.msrb.mxu1 %v912_v54  ;;  %955 = vmatpush.msrb.mxu0 %v928_v55 }
 0x3cb   : > { %1020 = vmatpush.msrb.mxu2 %v993_v9 }
 0x3cc   : > { %975 = vmatpush.msrb.mxu1 %v911_v56  ;;  %956 = vmatpush.msrb.mxu0 %v927_v57 }
 0x3cd   : > { %1021 = vmatpush.msrb.mxu2 %v992_v16 }
 0x3ce   : > { %976 = vmatpush.msrb.mxu1 %v910_v58  ;;  %957 = vmatpush.msrb.mxu0 %v926_v59 }
 0x3cf   : > { %958 = vmatmul.f32.vlgmr.msrb.gmra.mxu0 %v748_v61  ;;  %1022 = vmatpush.msrb.mxu2 %v991_v17 }
 0x3d0   : > { %977 = vmatpush.msrb.mxu1 %v909_v60 }
 0x3d1   : > { %1023 = vmatpush.msrb.mxu2 %v990_v18 }
 0x3d3   : > { %1024 = vmatpush.msrb.mxu2 %v989_v19 }
 0x42b   : > { %v798_v48 = vpop.f32.mrf.mxu0 }
 0x42c   : > { %v818_v49 = vpop.f32.mrf.mxu1 }
 0x42d   : > { %v819_v50 = vadd.f32 %v818_v49, %v798_v48 }
 0x42f   : > { %v825_v51 = vadd.f32 %v1999_v47, %v819_v50 }
 0x431   : > { %v826_v52 = vmax.f32 %v825_v51, 0.0 }
 0x433   : > { %897 = vmatmul.f32.vlgmr.msra.gmra.mxu3 %v826_v52  ;;  %1041 = vst [vmem:[#allocation12] sm:$0xff] %v826_v52 }
 0x436   : > { %v878_v10 = vpop.f32.mrf.mxu2 }
 0x44c   : > { %v959_v20 = vpop.f32.mrf.mxu0 }
 0x4b6   : > { %v898_v12 = vpop.f32.mrf.mxu3 }
 0x4b7   : > { %v899_v13 = vadd.f32 %v898_v12, %v878_v10 }
 0x4b9   : > { %v906_v14 = vadd.f32 %v2000_v11, %v899_v13 }
 0x4bb   : > { %v907_v15 = vmax.f32 %v906_v14, 0.0 }
 0x4bd   : > { %1042 = vst [vmem:[#allocation12 + $0x8] sm:$0xff] %v907_v15  ;;  %978 = vmatmul.f32.vlgmr.msrb.gmra.mxu1 %v907_v15 }
 0x53a   : > { %v979_v22 = vpop.f32.mrf.mxu1 }
 0x53b   : > { %v980_v23 = vadd.f32 %v979_v22, %v959_v20 }
 0x53d   : > { %v987_v24 = vadd.f32 %v2001_v21, %v980_v23 }
 0x53f   : > { %v988_v25 = vmax.f32 %v987_v24, 0.0 }
 0x541   : > { %1043 = vst [vmem:[#allocation12 + $0x10] sm:$0xff] %v988_v25  ;;  %1025 = vmatmul.f32.vlgmr.msrb.gmra.mxu2 %v988_v25 }
 0x5c4   : > { %v1026_v27 = vpop.f32.mrf.mxu2 }
 0x5c5   : > { %v1027_v28 = vadd.f32 %v2002_v26, %v1026_v27 }
 0x5c7   : > { %1029 = vmax.xlane.f32.xlu0 %v1027_v28 }
 0x63a   : > { %v1030_v29 = vpop.xlane.xlu0 %1029 }
 0x63b   : > { %v1031_v30 = vsub.f32 %v1027_v28, %v1030_v29 }
 0x63d   : > { %v1032_v31 = vmul.f32 1.442695, %v1031_v30 }
 0x63f   : > { %2003 = vpow2.f32 %v1032_v31 }
 0x645   : > { %v2004_v32 = vpop.eup %2003 }
 0x646   : > { %1034 = vadd.xlane.f32.xlu0 %v2004_v32 }
 0x6b9   : > { %v1035_v33 = vpop.xlane.xlu0 %1034 }
 0x6ba   : > { %2005 = vlog2.f32 %v1035_v33 }
 0x6c0   : > { %v2006_v34 = vpop.eup %2005 }
 0x6c1   : > { %v1037_v35 = vmul.f32 0.6931472, %v2006_v34 }
 0x6c3   : > { %v1038_v36 = vsub.f32 %v1031_v30, %v1037_v35 }
 0x6c5   : > { %1857 = vst [vmem:[%s2503_s3 + $0x8] sm:$0xff] %v1038_v36 }
 0x6c6 PF: > { %s1044_s12 = sadd.s32 2, %s2507_s5 }
 0x6c7   : > { %p1858_p9 = scmp.ge.s32.totalorder %s1044_s12, 10 }
 0x6c9   : > { %1048 = sbr.rel (%p1858_p9) target bundleno = 2566 (0xa06), region = 84 }
 0x6ce   : > { %v1087_v37 = vld [vmem:[#allocation8 + $0x78] sm:$0xff]  ;;  %v1086_v39 = vld [vmem:[#allocation8 + $0x70] sm:$0xff]  ;;  %v1085_v41 = vld [vmem:[#allocation8 + $0x68] sm:$0xff] }
 0x6cf   : > { %v1071_v38 = vld [vmem:[#allocation7 + $0x78] sm:$0xff]  ;;  %1088 = vmatpush.msra.mxu0 %v1087_v37  ;;  %v1070_v40 = vld [vmem:[#allocation7 + $0x70] sm:$0xff]  ;;  %v1069_v42 = vld [vmem:[#allocation7 + $0x68] sm:$0xff] }
 0x6d0   : > { %1108 = vmatpush.msra.mxu1 %v1071_v38  ;;  %v1084_v43 = vld [vmem:[#allocation8 + $0x60] sm:$0xff]  ;;  %v1083_v45 = vld [vmem:[#allocation8 + $0x58] sm:$0xff]  ;;  %v1082_v47 = vld [vmem:[#allocation8 + $0x50] sm:$0xff] }
 0x6d1   : > { %1089 = vmatpush.msra.mxu0 %v1086_v39  ;;  %v1068_v44 = vld [vmem:[#allocation7 + $0x60] sm:$0xff]  ;;  %v1067_v46 = vld [vmem:[#allocation7 + $0x58] sm:$0xff]  ;;  %v1066_v48 = vld [vmem:[#allocation7 + $0x50] sm:$0xff] }
 0x6d2   : > { %1109 = vmatpush.msra.mxu1 %v1070_v40  ;;  %v1081_v49 = vld [vmem:[#allocation8 + $0x48] sm:$0xff]  ;;  %v1080_v51 = vld [vmem:[#allocation8 + $0x40] sm:$0xff]  ;;  %v1167_v52 = vld [vmem:[#allocation8 + $0x178] sm:$0xff] }
 0x6d3   : > { %1090 = vmatpush.msra.mxu0 %v1085_v41  ;;  %v1065_v50 = vld [vmem:[#allocation7 + $0x48] sm:$0xff]  ;;  %v1150_v53 = vld [vmem:[#allocation8 + $0xf8] sm:$0xff]  ;;  %v1064_v54 = vld [vmem:[#allocation7 + $0x40] sm:$0xff]  ;;  %1168 = vmatpush.msra.mxu2 %v1167_v52 }
 0x6d4   : > { %1110 = vmatpush.msra.mxu1 %v1069_v42  ;;  %1188 = vmatpush.msra.mxu3 %v1150_v53  ;;  %v1166_v55 = vld [vmem:[#allocation8 + $0x170] sm:$0xff]  ;;  %v1165_v57 = vld [vmem:[#allocation8 + $0x168] sm:$0xff]  ;;  %v1079_v59 = vld [vmem:[#allocation8 + $0x38] sm:$0xff] }
 0x6d5   : > { %1091 = vmatpush.msra.mxu0 %v1084_v43  ;;  %v1149_v56 = vld [vmem:[#allocation8 + $0xf0] sm:$0xff]  ;;  %v1148_v58 = vld [vmem:[#allocation8 + $0xe8] sm:$0xff]  ;;  %v1063_v60 = vld [vmem:[#allocation7 + $0x38] sm:$0xff]  ;;  %1169 = vmatpush.msra.mxu2 %v1166_v55 }
 0x6d6   : > { %1111 = vmatpush.msra.mxu1 %v1068_v44  ;;  %1189 = vmatpush.msra.mxu3 %v1149_v56  ;;  %v1164_v61 = vld [vmem:[#allocation8 + $0x160] sm:$0xff]  ;;  %v1078_v63 = vld [vmem:[#allocation8 + $0x30] sm:$0xff]  ;;  %v1077_v1 = vld [vmem:[#allocation8 + $0x28] sm:$0xff] }
 0x6d7   : > { %1092 = vmatpush.msra.mxu0 %v1083_v45  ;;  %v1147_v62 = vld [vmem:[#allocation8 + $0xe0] sm:$0xff]  ;;  %v1062_v0 = vld [vmem:[#allocation7 + $0x30] sm:$0xff]  ;;  %1170 = vmatpush.msra.mxu2 %v1165_v57  ;;  %v1163_v2 = vld [vmem:[#allocation8 + $0x158] sm:$0xff] }
 0x6d8   : > { %1112 = vmatpush.msra.mxu1 %v1067_v46  ;;  %1190 = vmatpush.msra.mxu3 %v1148_v58  ;;  %v1146_v3 = vld [vmem:[#allocation8 + $0xd8] sm:$0xff]  ;;  %v1061_v4 = vld [vmem:[#allocation7 + $0x28] sm:$0xff]  ;;  %v1076_v5 = vld [vmem:[#allocation8 + $0x20] sm:$0xff] }
 0x6d9   : > { %1093 = vmatpush.msra.mxu0 %v1082_v47  ;;  %1171 = vmatpush.msra.mxu2 %v1164_v61  ;;  %v1162_v6 = vld [vmem:[#allocation8 + $0x150] sm:$0xff]  ;;  %v1060_v8 = vld [vmem:[#allocation7 + $0x20] sm:$0xff]  ;;  %v1161_v9 = vld [vmem:[#allocation8 + $0x148] sm:$0xff] }
 0x6da   : > { %1113 = vmatpush.msra.mxu1 %v1066_v48  ;;  %1191 = vmatpush.msra.mxu3 %v1147_v62  ;;  %v1145_v7 = vld [vmem:[#allocation8 + $0xd0] sm:$0xff]  ;;  %v1144_v10 = vld [vmem:[#allocation8 + $0xc8] sm:$0xff]  ;;  %v1075_v11 = vld [vmem:[#allocation8 + $0x18] sm:$0xff] }
 0x6db   : > { %1094 = vmatpush.msra.mxu0 %v1081_v49  ;;  %1172 = vmatpush.msra.mxu2 %v1163_v2  ;;  %v1059_v12 = vld [vmem:[#allocation7 + $0x18] sm:$0xff]  ;;  %v1160_v13 = vld [vmem:[#allocation8 + $0x140] sm:$0xff]  ;;  %v1074_v15 = vld [vmem:[#allocation8 + $0x10] sm:$0xff] }
 0x6dc   : > { %1114 = vmatpush.msra.mxu1 %v1065_v50  ;;  %1192 = vmatpush.msra.mxu3 %v1146_v3  ;;  %v1143_v14 = vld [vmem:[#allocation8 + $0xc0] sm:$0xff]  ;;  %v1058_v16 = vld [vmem:[#allocation7 + $0x10] sm:$0xff]  ;;  %v1159_v17 = vld [vmem:[#allocation8 + $0x138] sm:$0xff] }
 0x6dd   : > { %1095 = vmatpush.msra.mxu0 %v1080_v51  ;;  %1173 = vmatpush.msra.mxu2 %v1162_v6  ;;  %v1142_v18 = vld [vmem:[#allocation8 + $0xb8] sm:$0xff]  ;;  %v1073_v19 = vld [vmem:[#allocation8 + $0x8] sm:$0xff]  ;;  %v1158_v21 = vld [vmem:[#allocation8 + $0x130] sm:$0xff] }
 0x6de   : > { %1115 = vmatpush.msra.mxu1 %v1064_v54  ;;  %1193 = vmatpush.msra.mxu3 %v1145_v7  ;;  %v1057_v20 = vld [vmem:[#allocation7 + $0x8] sm:$0xff]  ;;  %v1141_v22 = vld [vmem:[#allocation8 + $0xb0] sm:$0xff]  ;;  %v1072_v23 = vld [vmem:[#allocation8] sm:$0xff] }
 0x6df   : > { %1096 = vmatpush.msra.mxu0 %v1079_v59  ;;  %1174 = vmatpush.msra.mxu2 %v1161_v9  ;;  %v1056_v24 = vld [vmem:[#allocation7] sm:$0xff]  ;;  %v1859_v26 = vld [vmem:[%s2489_s22 + $0x10] sm:$0xff]  ;;  %v1157_v27 = vld [vmem:[#allocation8 + $0x128] sm:$0xff] }
 0x6e0   : > { %1116 = vmatpush.msra.mxu1 %v1063_v60  ;;  %1194 = vmatpush.msra.mxu3 %v1144_v10  ;;  %v1051_v25 = vld [vmem:[#allocation12] sm:$0xff]  ;;  %v1140_v28 = vld [vmem:[#allocation8 + $0xa8] sm:$0xff]  ;;  %v1155_v31 = vld [vmem:[#allocation8 + $0x118] sm:$0xff] }
 0x6e1   : > { %1097 = vmatpush.msra.mxu0 %v1078_v63  ;;  %1175 = vmatpush.msra.mxu2 %v1160_v13  ;;  %v1156_v29 = vld [vmem:[#allocation8 + $0x120] sm:$0xff]  ;;  %v1138_v32 = vld [vmem:[#allocation8 + $0x98] sm:$0xff]  ;;  %v1154_v33 = vld [vmem:[#allocation8 + $0x110] sm:$0xff] }
 0x6e2   : > { %1117 = vmatpush.msra.mxu1 %v1062_v0  ;;  %1195 = vmatpush.msra.mxu3 %v1143_v14  ;;  %v1139_v30 = vld [vmem:[#allocation8 + $0xa0] sm:$0xff]  ;;  %v1137_v34 = vld [vmem:[#allocation8 + $0x90] sm:$0xff]  ;;  %v1153_v35 = vld [vmem:[#allocation8 + $0x108] sm:$0xff] }
 0x6e3   : > { %1098 = vmatpush.msra.mxu0 %v1077_v1  ;;  %1176 = vmatpush.msra.mxu2 %v1159_v17  ;;  %v1136_v36 = vld [vmem:[#allocation8 + $0x88] sm:$0xff]  ;;  %v1152_v37 = vld [vmem:[#allocation8 + $0x100] sm:$0xff]  ;;  %v1248_v40 = vld [vmem:[#allocation8 + $0x278] sm:$0xff] }
 0x6e4   : > { %1118 = vmatpush.msra.mxu1 %v1061_v4  ;;  %1196 = vmatpush.msra.mxu3 %v1142_v18  ;;  %v1135_v38 = vld [vmem:[#allocation8 + $0x80] sm:$0xff]  ;;  %v1053_v39 = vld [vmem:[#allocation12 + $0x8] sm:$0xff]  ;;  %v1231_v41 = vld [vmem:[#allocation8 + $0x1f8] sm:$0xff] }
 0x6e5   : > { %1099 = vmatpush.msra.mxu0 %v1076_v5  ;;  %1177 = vmatpush.msra.mxu2 %v1158_v21  ;;  %v1247_v42 = vld [vmem:[#allocation8 + $0x270] sm:$0xff]  ;;  %v1246_v44 = vld [vmem:[#allocation8 + $0x268] sm:$0xff]  ;;  %v1245_v46 = vld [vmem:[#allocation8 + $0x260] sm:$0xff] }
 0x6e6   : > { %1119 = vmatpush.msra.mxu1 %v1060_v8  ;;  %1197 = vmatpush.msra.mxu3 %v1141_v22  ;;  %v1230_v43 = vld [vmem:[#allocation8 + $0x1f0] sm:$0xff]  ;;  %v1229_v45 = vld [vmem:[#allocation8 + $0x1e8] sm:$0xff]  ;;  %v1228_v47 = vld [vmem:[#allocation8 + $0x1e0] sm:$0xff] }
 0x6e7   : > { %1100 = vmatpush.msra.mxu0 %v1075_v11  ;;  %1178 = vmatpush.msra.mxu2 %v1157_v27  ;;  %v1244_v48 = vld [vmem:[#allocation8 + $0x258] sm:$0xff]  ;;  %v1243_v50 = vld [vmem:[#allocation8 + $0x250] sm:$0xff]  ;;  %v1242_v52 = vld [vmem:[#allocation8 + $0x248] sm:$0xff] }
 0x6e8   : > { %1120 = vmatpush.msra.mxu1 %v1059_v12  ;;  %1198 = vmatpush.msra.mxu3 %v1140_v28  ;;  %v1227_v49 = vld [vmem:[#allocation8 + $0x1d8] sm:$0xff]  ;;  %v1226_v51 = vld [vmem:[#allocation8 + $0x1d0] sm:$0xff]  ;;  %v1225_v53 = vld [vmem:[#allocation8 + $0x1c8] sm:$0xff] }
 0x6e9   : > { %1101 = vmatpush.msra.mxu0 %v1074_v15  ;;  %1179 = vmatpush.msra.mxu2 %v1156_v29  ;;  %v1241_v54 = vld [vmem:[#allocation8 + $0x240] sm:$0xff]  ;;  %v1240_v56 = vld [vmem:[#allocation8 + $0x238] sm:$0xff]  ;;  %v1239_v58 = vld [vmem:[#allocation8 + $0x230] sm:$0xff] }
 0x6ea   : > { %1121 = vmatpush.msra.mxu1 %v1058_v16  ;;  %1199 = vmatpush.msra.mxu3 %v1139_v30  ;;  %v1224_v55 = vld [vmem:[#allocation8 + $0x1c0] sm:$0xff]  ;;  %v1223_v57 = vld [vmem:[#allocation8 + $0x1b8] sm:$0xff]  ;;  %v1222_v59 = vld [vmem:[#allocation8 + $0x1b0] sm:$0xff] }
 0x6eb   : > { %1102 = vmatpush.msra.mxu0 %v1073_v19  ;;  %1180 = vmatpush.msra.mxu2 %v1155_v31  ;;  %v1238_v60 = vld [vmem:[#allocation8 + $0x228] sm:$0xff]  ;;  %v1237_v62 = vld [vmem:[#allocation8 + $0x220] sm:$0xff]  ;;  %v1236_v6 = vld [vmem:[#allocation8 + $0x218] sm:$0xff] }
 0x6ec   : > { %1122 = vmatpush.msra.mxu1 %v1057_v20  ;;  %1200 = vmatpush.msra.mxu3 %v1138_v32  ;;  %v1221_v61 = vld [vmem:[#allocation8 + $0x1a8] sm:$0xff]  ;;  %v1220_v63 = vld [vmem:[#allocation8 + $0x1a0] sm:$0xff]  ;;  %v1219_v7 = vld [vmem:[#allocation8 + $0x198] sm:$0xff] }
 0x6ed   : > { %1103 = vmatpush.msra.mxu0 %v1072_v23  ;;  %1181 = vmatpush.msra.mxu2 %v1154_v33  ;;  %v2007_v0 = vld [vmem:[%s2620_s4] ss:$0 sm:$0xff]  ;;  %v1235_v8 = vld [vmem:[#allocation8 + $0x210] sm:$0xff]  ;;  %v1233_v12 = vld [vmem:[#allocation8 + $0x200] sm:$0xff] }
 0x6ee   : > { %1123 = vmatpush.msra.mxu1 %v1056_v24  ;;  %1104 = vmatmul.f32.vlgmr.msra.gmra.mxu0 %v1051_v25  ;;  %v1218_v9 = vld [vmem:[#allocation8 + $0x190] sm:$0xff]  ;;  %v1234_v10 = vld [vmem:[#allocation8 + $0x208] sm:$0xff]  ;;  %v1216_v13 = vld [vmem:[#allocation8 + $0x180] sm:$0xff] }
 0x6ef   : > { %1124 = vmatmul.f32.vlgmr.msra.gmra.mxu1 %v1859_v26  ;;  %1201 = vmatpush.msra.mxu3 %v1137_v34  ;;  %v1217_v11 = vld [vmem:[#allocation8 + $0x188] sm:$0xff]  ;;  %v1055_v14 = vld [vmem:[#allocation12 + $0x10] sm:$0xff]  ;;  %v1311_v15 = vld [vmem:[#allocation10 + $0x78] sm:$0xff] }
 0x6f0   : > { %1182 = vmatpush.msra.mxu2 %v1153_v35  ;;  %1249 = vmatpush.msrb.mxu0 %v1248_v40  ;;  %v1310_v16 = vld [vmem:[#allocation10 + $0x70] sm:$0xff]  ;;  %v1309_v17 = vld [vmem:[#allocation10 + $0x68] sm:$0xff]  ;;  %v1308_v18 = vld [vmem:[#allocation10 + $0x60] sm:$0xff] }
 0x6f1   : > { %1202 = vmatpush.msra.mxu3 %v1136_v36  ;;  %1269 = vmatpush.msrb.mxu1 %v1231_v41  ;;  %v1307_v19 = vld [vmem:[#allocation10 + $0x58] sm:$0xff]  ;;  %v1306_v20 = vld [vmem:[#allocation10 + $0x50] sm:$0xff]  ;;  %v1305_v21 = vld [vmem:[#allocation10 + $0x48] sm:$0xff] }
 0x6f2   : > { %1183 = vmatpush.msra.mxu2 %v1152_v37  ;;  %1250 = vmatpush.msrb.mxu0 %v1247_v42  ;;  %v1304_v22 = vld [vmem:[#allocation10 + $0x40] sm:$0xff]  ;;  %v1303_v23 = vld [vmem:[#allocation10 + $0x38] sm:$0xff]  ;;  %v1302_v24 = vld [vmem:[#allocation10 + $0x30] sm:$0xff] }
 0x6f3   : > { %1203 = vmatpush.msra.mxu3 %v1135_v38  ;;  %1184 = vmatmul.f32.vlgmr.msra.gmra.mxu2 %v1053_v39  ;;  %v1301_v25 = vld [vmem:[#allocation10 + $0x28] sm:$0xff]  ;;  %v1300_v26 = vld [vmem:[#allocation10 + $0x20] sm:$0xff]  ;;  %v1299_v33 = vld [vmem:[#allocation10 + $0x18] sm:$0xff] }
 0x6f4   : > { %1270 = vmatpush.msrb.mxu1 %v1230_v43  ;;  %1251 = vmatpush.msrb.mxu0 %v1246_v44  ;;  %v2008_v28 = vld [vmem:[%s2620_s4 + $0x1] ss:$0 sm:$0xff]  ;;  %v1298_v34 = vld [vmem:[#allocation10 + $0x10] sm:$0xff]  ;;  %v1296_v36 = vld [vmem:[#allocation10] sm:$0xff] }
 0x6f5   : > { %1316 = vmatpush.msrb.mxu2 %v1311_v15  ;;  %v1297_v35 = vld [vmem:[#allocation10 + $0x8] sm:$0xff] }
 0x6f6   : > { %1271 = vmatpush.msrb.mxu1 %v1229_v45  ;;  %1252 = vmatpush.msrb.mxu0 %v1245_v46  ;;  %v2009_v38 = vld [vmem:[%s2620_s4 + $0x2] ss:$0 sm:$0xff]  ;;  %v2010_v43 = vld [vmem:[%s2622_s6] ss:$0 sm:$0xff] }
 0x6f7   : > { %1317 = vmatpush.msrb.mxu2 %v1310_v16 }
 0x6f8   : > { %1272 = vmatpush.msrb.mxu1 %v1228_v47  ;;  %1253 = vmatpush.msrb.mxu0 %v1244_v48 }
 0x6f9   : > { %1318 = vmatpush.msrb.mxu2 %v1309_v17 }
 0x6fa   : > { %1273 = vmatpush.msrb.mxu1 %v1227_v49  ;;  %1254 = vmatpush.msrb.mxu0 %v1243_v50 }
 0x6fb   : > { %1319 = vmatpush.msrb.mxu2 %v1308_v18 }
 0x6fc   : > { %1274 = vmatpush.msrb.mxu1 %v1226_v51  ;;  %1255 = vmatpush.msrb.mxu0 %v1242_v52 }
 0x6fd   : > { %1320 = vmatpush.msrb.mxu2 %v1307_v19 }
 0x6fe   : > { %1275 = vmatpush.msrb.mxu1 %v1225_v53  ;;  %1256 = vmatpush.msrb.mxu0 %v1241_v54 }
 0x6ff   : > { %1321 = vmatpush.msrb.mxu2 %v1306_v20 }
 0x700   : > { %1276 = vmatpush.msrb.mxu1 %v1224_v55  ;;  %1257 = vmatpush.msrb.mxu0 %v1240_v56 }
 0x701   : > { %1322 = vmatpush.msrb.mxu2 %v1305_v21 }
 0x702   : > { %1277 = vmatpush.msrb.mxu1 %v1223_v57  ;;  %1258 = vmatpush.msrb.mxu0 %v1239_v58 }
 0x703   : > { %1323 = vmatpush.msrb.mxu2 %v1304_v22 }
 0x704   : > { %1278 = vmatpush.msrb.mxu1 %v1222_v59  ;;  %1259 = vmatpush.msrb.mxu0 %v1238_v60 }
 0x705   : > { %1324 = vmatpush.msrb.mxu2 %v1303_v23 }
 0x706   : > { %1279 = vmatpush.msrb.mxu1 %v1221_v61  ;;  %1260 = vmatpush.msrb.mxu0 %v1237_v62 }
 0x707   : > { %1325 = vmatpush.msrb.mxu2 %v1302_v24 }
 0x708   : > { %1280 = vmatpush.msrb.mxu1 %v1220_v63  ;;  %1261 = vmatpush.msrb.mxu0 %v1236_v6 }
 0x709   : > { %1326 = vmatpush.msrb.mxu2 %v1301_v25 }
 0x70a   : > { %1281 = vmatpush.msrb.mxu1 %v1219_v7  ;;  %1262 = vmatpush.msrb.mxu0 %v1235_v8 }
 0x70b   : > { %1327 = vmatpush.msrb.mxu2 %v1300_v26 }
 0x70c   : > { %1282 = vmatpush.msrb.mxu1 %v1218_v9  ;;  %1263 = vmatpush.msrb.mxu0 %v1234_v10 }
 0x70d   : > { %1328 = vmatpush.msrb.mxu2 %v1299_v33 }
 0x70e   : > { %1283 = vmatpush.msrb.mxu1 %v1217_v11  ;;  %1264 = vmatpush.msrb.mxu0 %v1233_v12 }
 0x70f   : > { %1265 = vmatmul.f32.vlgmr.msrb.gmra.mxu0 %v1055_v14  ;;  %1329 = vmatpush.msrb.mxu2 %v1298_v34 }
 0x710   : > { %1284 = vmatpush.msrb.mxu1 %v1216_v13 }
 0x711   : > { %1330 = vmatpush.msrb.mxu2 %v1297_v35 }
 0x713   : > { %1331 = vmatpush.msrb.mxu2 %v1296_v36 }
 0x76b   : > { %v1105_v1 = vpop.f32.mrf.mxu0 }
 0x76c   : > { %v1125_v2 = vpop.f32.mrf.mxu1 }
 0x76d   : > { %v1126_v3 = vadd.f32 %v1125_v2, %v1105_v1 }
 0x76f   : > { %v1132_v4 = vadd.f32 %v2007_v0, %v1126_v3 }
 0x771   : > { %v1133_v5 = vmax.f32 %v1132_v4, 0.0 }
 0x773   : > { %1204 = vmatmul.f32.vlgmr.msra.gmra.mxu3 %v1133_v5  ;;  %1348 = vst [vmem:[#allocation12] sm:$0xff] %v1133_v5 }
 0x776   : > { %v1185_v27 = vpop.f32.mrf.mxu2 }
 0x78c   : > { %v1266_v37 = vpop.f32.mrf.mxu0 }
 0x7f6   : > { %v1205_v29 = vpop.f32.mrf.mxu3 }
 0x7f7   : > { %v1206_v30 = vadd.f32 %v1205_v29, %v1185_v27 }
 0x7f9   : > { %v1213_v31 = vadd.f32 %v2008_v28, %v1206_v30 }
 0x7fb   : > { %v1214_v32 = vmax.f32 %v1213_v31, 0.0 }
 0x7fd   : > { %1349 = vst [vmem:[#allocation12 + $0x8] sm:$0xff] %v1214_v32  ;;  %1285 = vmatmul.f32.vlgmr.msrb.gmra.mxu1 %v1214_v32 }
 0x87a   : > { %v1286_v39 = vpop.f32.mrf.mxu1 }
 0x87b   : > { %v1287_v40 = vadd.f32 %v1286_v39, %v1266_v37 }
 0x87d   : > { %v1294_v41 = vadd.f32 %v2009_v38, %v1287_v40 }
 0x87f   : > { %v1295_v42 = vmax.f32 %v1294_v41, 0.0 }
 0x881   : > { %1350 = vst [vmem:[#allocation12 + $0x10] sm:$0xff] %v1295_v42  ;;  %1332 = vmatmul.f32.vlgmr.msrb.gmra.mxu2 %v1295_v42 }
 0x904   : > { %v1333_v44 = vpop.f32.mrf.mxu2 }
 0x905   : > { %v1334_v45 = vadd.f32 %v2010_v43, %v1333_v44 }
 0x907   : > { %1336 = vmax.xlane.f32.xlu0 %v1334_v45 }
 0x97a   : > { %v1337_v46 = vpop.xlane.xlu0 %1336 }
 0x97b   : > { %v1338_v47 = vsub.f32 %v1334_v45, %v1337_v46 }
 0x97d   : > { %v1339_v48 = vmul.f32 1.442695, %v1338_v47 }
 0x97f   : > { %2011 = vpow2.f32 %v1339_v48 }
 0x985   : > { %v2012_v49 = vpop.eup %2011 }
 0x986   : > { %1341 = vadd.xlane.f32.xlu0 %v2012_v49 }
 0x9f9   : > { %v1342_v50 = vpop.xlane.xlu0 %1341 }
 0x9fa   : > { %2013 = vlog2.f32 %v1342_v50 }
 0xa00   : > { %v2014_v51 = vpop.eup %2013 }
 0xa01   : > { %v1344_v52 = vmul.f32 0.6931472, %v2014_v51 }
 0xa03   : > { %v1345_v53 = vsub.f32 %v1338_v47, %v1344_v52 }
 0xa05   : > { %1862 = vst [vmem:[%s2503_s3 + $0x10] sm:$0xff] %v1345_v53 }
 0xa06 PF: > { %s1351_s13 = sadd.s32 3, %s2507_s5 }
 0xa07   : > { %p1863_p11 = scmp.ge.s32.totalorder %s1351_s13, 10 }
 0xa09   : > { %1355 = sbr.rel (%p1863_p11) target bundleno = 3398 (0xd46), region = 88 }
 0xa0e   : > { %v1394_v54 = vld [vmem:[#allocation8 + $0x78] sm:$0xff]  ;;  %v1393_v56 = vld [vmem:[#allocation8 + $0x70] sm:$0xff]  ;;  %v1392_v58 = vld [vmem:[#allocation8 + $0x68] sm:$0xff] }
 0xa0f   : > { %v1378_v55 = vld [vmem:[#allocation7 + $0x78] sm:$0xff]  ;;  %1395 = vmatpush.msra.mxu0 %v1394_v54  ;;  %v1377_v57 = vld [vmem:[#allocation7 + $0x70] sm:$0xff]  ;;  %v1376_v59 = vld [vmem:[#allocation7 + $0x68] sm:$0xff] }
 0xa10   : > { %1415 = vmatpush.msra.mxu1 %v1378_v55  ;;  %v1391_v60 = vld [vmem:[#allocation8 + $0x60] sm:$0xff]  ;;  %v1390_v62 = vld [vmem:[#allocation8 + $0x58] sm:$0xff]  ;;  %v1389_v0 = vld [vmem:[#allocation8 + $0x50] sm:$0xff] }
 0xa11   : > { %1396 = vmatpush.msra.mxu0 %v1393_v56  ;;  %v1375_v61 = vld [vmem:[#allocation7 + $0x60] sm:$0xff]  ;;  %v1374_v63 = vld [vmem:[#allocation7 + $0x58] sm:$0xff]  ;;  %v1373_v1 = vld [vmem:[#allocation7 + $0x50] sm:$0xff] }
 0xa12   : > { %1416 = vmatpush.msra.mxu1 %v1377_v57  ;;  %v1388_v2 = vld [vmem:[#allocation8 + $0x48] sm:$0xff]  ;;  %v1387_v4 = vld [vmem:[#allocation8 + $0x40] sm:$0xff]  ;;  %v1474_v5 = vld [vmem:[#allocation8 + $0x178] sm:$0xff] }
 0xa13   : > { %1397 = vmatpush.msra.mxu0 %v1392_v58  ;;  %v1372_v3 = vld [vmem:[#allocation7 + $0x48] sm:$0xff]  ;;  %v1457_v6 = vld [vmem:[#allocation8 + $0xf8] sm:$0xff]  ;;  %v1371_v7 = vld [vmem:[#allocation7 + $0x40] sm:$0xff]  ;;  %1475 = vmatpush.msra.mxu2 %v1474_v5 }
 0xa14   : > { %1417 = vmatpush.msra.mxu1 %v1376_v59  ;;  %1495 = vmatpush.msra.mxu3 %v1457_v6  ;;  %v1473_v8 = vld [vmem:[#allocation8 + $0x170] sm:$0xff]  ;;  %v1472_v10 = vld [vmem:[#allocation8 + $0x168] sm:$0xff]  ;;  %v1386_v12 = vld [vmem:[#allocation8 + $0x38] sm:$0xff] }
 0xa15   : > { %1398 = vmatpush.msra.mxu0 %v1391_v60  ;;  %v1456_v9 = vld [vmem:[#allocation8 + $0xf0] sm:$0xff]  ;;  %v1455_v11 = vld [vmem:[#allocation8 + $0xe8] sm:$0xff]  ;;  %v1370_v13 = vld [vmem:[#allocation7 + $0x38] sm:$0xff]  ;;  %1476 = vmatpush.msra.mxu2 %v1473_v8 }
 0xa16   : > { %1418 = vmatpush.msra.mxu1 %v1375_v61  ;;  %1496 = vmatpush.msra.mxu3 %v1456_v9  ;;  %v1471_v14 = vld [vmem:[#allocation8 + $0x160] sm:$0xff]  ;;  %v1385_v16 = vld [vmem:[#allocation8 + $0x30] sm:$0xff]  ;;  %v1384_v18 = vld [vmem:[#allocation8 + $0x28] sm:$0xff] }
 0xa17   : > { %1399 = vmatpush.msra.mxu0 %v1390_v62  ;;  %v1454_v15 = vld [vmem:[#allocation8 + $0xe0] sm:$0xff]  ;;  %v1369_v17 = vld [vmem:[#allocation7 + $0x30] sm:$0xff]  ;;  %1477 = vmatpush.msra.mxu2 %v1472_v10  ;;  %v1470_v19 = vld [vmem:[#allocation8 + $0x158] sm:$0xff] }
 0xa18   : > { %1419 = vmatpush.msra.mxu1 %v1374_v63  ;;  %1497 = vmatpush.msra.mxu3 %v1455_v11  ;;  %v1453_v20 = vld [vmem:[#allocation8 + $0xd8] sm:$0xff]  ;;  %v1368_v21 = vld [vmem:[#allocation7 + $0x28] sm:$0xff]  ;;  %v1383_v22 = vld [vmem:[#allocation8 + $0x20] sm:$0xff] }
 0xa19   : > { %1400 = vmatpush.msra.mxu0 %v1389_v0  ;;  %1478 = vmatpush.msra.mxu2 %v1471_v14  ;;  %v1469_v23 = vld [vmem:[#allocation8 + $0x150] sm:$0xff]  ;;  %v1367_v25 = vld [vmem:[#allocation7 + $0x20] sm:$0xff]  ;;  %v1468_v26 = vld [vmem:[#allocation8 + $0x148] sm:$0xff] }
 0xa1a   : > { %1420 = vmatpush.msra.mxu1 %v1373_v1  ;;  %1498 = vmatpush.msra.mxu3 %v1454_v15  ;;  %v1452_v24 = vld [vmem:[#allocation8 + $0xd0] sm:$0xff]  ;;  %v1451_v27 = vld [vmem:[#allocation8 + $0xc8] sm:$0xff]  ;;  %v1382_v28 = vld [vmem:[#allocation8 + $0x18] sm:$0xff] }
 0xa1b   : > { %1401 = vmatpush.msra.mxu0 %v1388_v2  ;;  %1479 = vmatpush.msra.mxu2 %v1470_v19  ;;  %v1366_v29 = vld [vmem:[#allocation7 + $0x18] sm:$0xff]  ;;  %v1467_v30 = vld [vmem:[#allocation8 + $0x140] sm:$0xff]  ;;  %v1381_v32 = vld [vmem:[#allocation8 + $0x10] sm:$0xff] }
 0xa1c   : > { %1421 = vmatpush.msra.mxu1 %v1372_v3  ;;  %1499 = vmatpush.msra.mxu3 %v1453_v20  ;;  %v1450_v31 = vld [vmem:[#allocation8 + $0xc0] sm:$0xff]  ;;  %v1365_v33 = vld [vmem:[#allocation7 + $0x10] sm:$0xff]  ;;  %v1466_v34 = vld [vmem:[#allocation8 + $0x138] sm:$0xff] }
 0xa1d   : > { %1402 = vmatpush.msra.mxu0 %v1387_v4  ;;  %1480 = vmatpush.msra.mxu2 %v1469_v23  ;;  %v1449_v35 = vld [vmem:[#allocation8 + $0xb8] sm:$0xff]  ;;  %v1380_v36 = vld [vmem:[#allocation8 + $0x8] sm:$0xff]  ;;  %v1465_v38 = vld [vmem:[#allocation8 + $0x130] sm:$0xff] }
 0xa1e   : > { %1422 = vmatpush.msra.mxu1 %v1371_v7  ;;  %1500 = vmatpush.msra.mxu3 %v1452_v24  ;;  %v1364_v37 = vld [vmem:[#allocation7 + $0x8] sm:$0xff]  ;;  %v1448_v39 = vld [vmem:[#allocation8 + $0xb0] sm:$0xff]  ;;  %v1379_v40 = vld [vmem:[#allocation8] sm:$0xff] }
 0xa1f   : > { %1403 = vmatpush.msra.mxu0 %v1386_v12  ;;  %1481 = vmatpush.msra.mxu2 %v1468_v26  ;;  %v1363_v41 = vld [vmem:[#allocation7] sm:$0xff]  ;;  %v1464_v44 = vld [vmem:[#allocation8 + $0x128] sm:$0xff]  ;;  %v1462_v48 = vld [vmem:[#allocation8 + $0x118] sm:$0xff] }
 0xa20   : > { %1423 = vmatpush.msra.mxu1 %v1370_v13  ;;  %1501 = vmatpush.msra.mxu3 %v1451_v27  ;;  %v1358_v42 = vld [vmem:[#allocation12] sm:$0xff]  ;;  %v1447_v45 = vld [vmem:[#allocation8 + $0xa8] sm:$0xff]  ;;  %v1445_v49 = vld [vmem:[#allocation8 + $0x98] sm:$0xff] }
 0xa21   : > { %1404 = vmatpush.msra.mxu0 %v1385_v16  ;;  %1482 = vmatpush.msra.mxu2 %v1467_v30  ;;  %v1864_v43 = vld [vmem:[%s2489_s22 + $0x18] sm:$0xff]  ;;  %v1461_v50 = vld [vmem:[#allocation8 + $0x110] sm:$0xff]  ;;  %v1460_v52 = vld [vmem:[#allocation8 + $0x108] sm:$0xff] }
 0xa22   : > { %1424 = vmatpush.msra.mxu1 %v1369_v17  ;;  %1502 = vmatpush.msra.mxu3 %v1450_v31  ;;  %v1463_v46 = vld [vmem:[#allocation8 + $0x120] sm:$0xff]  ;;  %v1444_v51 = vld [vmem:[#allocation8 + $0x90] sm:$0xff]  ;;  %v1443_v53 = vld [vmem:[#allocation8 + $0x88] sm:$0xff] }
 0xa23   : > { %1405 = vmatpush.msra.mxu0 %v1384_v18  ;;  %1483 = vmatpush.msra.mxu2 %v1466_v34  ;;  %v1446_v47 = vld [vmem:[#allocation8 + $0xa0] sm:$0xff]  ;;  %v1360_v56 = vld [vmem:[#allocation12 + $0x8] sm:$0xff]  ;;  %v1555_v57 = vld [vmem:[#allocation8 + $0x278] sm:$0xff] }
 0xa24   : > { %1425 = vmatpush.msra.mxu1 %v1368_v21  ;;  %1503 = vmatpush.msra.mxu3 %v1449_v35  ;;  %v1459_v54 = vld [vmem:[#allocation8 + $0x100] sm:$0xff]  ;;  %v1538_v58 = vld [vmem:[#allocation8 + $0x1f8] sm:$0xff]  ;;  %v1554_v59 = vld [vmem:[#allocation8 + $0x270] sm:$0xff] }
 0xa25   : > { %1406 = vmatpush.msra.mxu0 %v1383_v22  ;;  %1484 = vmatpush.msra.mxu2 %v1465_v38  ;;  %v1442_v55 = vld [vmem:[#allocation8 + $0x80] sm:$0xff]  ;;  %v1537_v60 = vld [vmem:[#allocation8 + $0x1f0] sm:$0xff]  ;;  %v1553_v61 = vld [vmem:[#allocation8 + $0x268] sm:$0xff] }
 0xa26   : > { %1426 = vmatpush.msra.mxu1 %v1367_v25  ;;  %1504 = vmatpush.msra.mxu3 %v1448_v39  ;;  %v1536_v62 = vld [vmem:[#allocation8 + $0x1e8] sm:$0xff]  ;;  %v1552_v63 = vld [vmem:[#allocation8 + $0x260] sm:$0xff]  ;;  %v1551_v1 = vld [vmem:[#allocation8 + $0x258] sm:$0xff] }
 0xa27   : > { %1407 = vmatpush.msra.mxu0 %v1382_v28  ;;  %1485 = vmatpush.msra.mxu2 %v1464_v44  ;;  %v1535_v0 = vld [vmem:[#allocation8 + $0x1e0] sm:$0xff]  ;;  %v1534_v2 = vld [vmem:[#allocation8 + $0x1d8] sm:$0xff]  ;;  %v1550_v3 = vld [vmem:[#allocation8 + $0x250] sm:$0xff] }
 0xa28   : > { %1427 = vmatpush.msra.mxu1 %v1366_v29  ;;  %1505 = vmatpush.msra.mxu3 %v1447_v45  ;;  %v1533_v4 = vld [vmem:[#allocation8 + $0x1d0] sm:$0xff]  ;;  %v1549_v5 = vld [vmem:[#allocation8 + $0x248] sm:$0xff]  ;;  %v1548_v7 = vld [vmem:[#allocation8 + $0x240] sm:$0xff] }
 0xa29   : > { %1408 = vmatpush.msra.mxu0 %v1381_v32  ;;  %1486 = vmatpush.msra.mxu2 %v1463_v46  ;;  %v1532_v6 = vld [vmem:[#allocation8 + $0x1c8] sm:$0xff]  ;;  %v1531_v8 = vld [vmem:[#allocation8 + $0x1c0] sm:$0xff]  ;;  %v1547_v9 = vld [vmem:[#allocation8 + $0x238] sm:$0xff] }
 0xa2a   : > { %1428 = vmatpush.msra.mxu1 %v1365_v33  ;;  %1506 = vmatpush.msra.mxu3 %v1446_v47  ;;  %v1530_v10 = vld [vmem:[#allocation8 + $0x1b8] sm:$0xff]  ;;  %v1546_v11 = vld [vmem:[#allocation8 + $0x230] sm:$0xff]  ;;  %v1545_v13 = vld [vmem:[#allocation8 + $0x228] sm:$0xff] }
 0xa2b   : > { %1409 = vmatpush.msra.mxu0 %v1380_v36  ;;  %1487 = vmatpush.msra.mxu2 %v1462_v48  ;;  %v1529_v12 = vld [vmem:[#allocation8 + $0x1b0] sm:$0xff]  ;;  %v1528_v14 = vld [vmem:[#allocation8 + $0x1a8] sm:$0xff]  ;;  %v1544_v15 = vld [vmem:[#allocation8 + $0x220] sm:$0xff] }
 0xa2c   : > { %1429 = vmatpush.msra.mxu1 %v1364_v37  ;;  %1507 = vmatpush.msra.mxu3 %v1445_v49  ;;  %v1527_v16 = vld [vmem:[#allocation8 + $0x1a0] sm:$0xff]  ;;  %v2015_v17 = vld [vmem:[%s2620_s4] ss:$0 sm:$0xff]  ;;  %v1543_v23 = vld [vmem:[#allocation8 + $0x218] sm:$0xff] }
 0xa2d   : > { %1410 = vmatpush.msra.mxu0 %v1379_v40  ;;  %1488 = vmatpush.msra.mxu2 %v1461_v50  ;;  %v1526_v24 = vld [vmem:[#allocation8 + $0x198] sm:$0xff]  ;;  %v1542_v25 = vld [vmem:[#allocation8 + $0x210] sm:$0xff]  ;;  %v1541_v27 = vld [vmem:[#allocation8 + $0x208] sm:$0xff] }
 0xa2e   : > { %1430 = vmatpush.msra.mxu1 %v1363_v41  ;;  %1411 = vmatmul.f32.vlgmr.msra.gmra.mxu0 %v1358_v42  ;;  %v1525_v26 = vld [vmem:[#allocation8 + $0x190] sm:$0xff]  ;;  %v1524_v28 = vld [vmem:[#allocation8 + $0x188] sm:$0xff]  ;;  %v1540_v29 = vld [vmem:[#allocation8 + $0x200] sm:$0xff] }
 0xa2f   : > { %1431 = vmatmul.f32.vlgmr.msra.gmra.mxu1 %v1864_v43  ;;  %1508 = vmatpush.msra.mxu3 %v1444_v51  ;;  %v1523_v30 = vld [vmem:[#allocation8 + $0x180] sm:$0xff]  ;;  %v1362_v31 = vld [vmem:[#allocation12 + $0x10] sm:$0xff]  ;;  %v1618_v32 = vld [vmem:[#allocation10 + $0x78] sm:$0xff] }
 0xa30   : > { %1489 = vmatpush.msra.mxu2 %v1460_v52  ;;  %1556 = vmatpush.msrb.mxu0 %v1555_v57  ;;  %v1617_v33 = vld [vmem:[#allocation10 + $0x70] sm:$0xff]  ;;  %v1616_v34 = vld [vmem:[#allocation10 + $0x68] sm:$0xff]  ;;  %v1615_v35 = vld [vmem:[#allocation10 + $0x60] sm:$0xff] }
 0xa31   : > { %1509 = vmatpush.msra.mxu3 %v1443_v53  ;;  %1576 = vmatpush.msrb.mxu1 %v1538_v58  ;;  %v1614_v36 = vld [vmem:[#allocation10 + $0x58] sm:$0xff]  ;;  %v1613_v37 = vld [vmem:[#allocation10 + $0x50] sm:$0xff]  ;;  %v1612_v38 = vld [vmem:[#allocation10 + $0x48] sm:$0xff] }
 0xa32   : > { %1490 = vmatpush.msra.mxu2 %v1459_v54  ;;  %1557 = vmatpush.msrb.mxu0 %v1554_v59  ;;  %v1611_v39 = vld [vmem:[#allocation10 + $0x40] sm:$0xff]  ;;  %v1610_v40 = vld [vmem:[#allocation10 + $0x38] sm:$0xff]  ;;  %v1609_v41 = vld [vmem:[#allocation10 + $0x30] sm:$0xff] }
 0xa33   : > { %1510 = vmatpush.msra.mxu3 %v1442_v55  ;;  %1491 = vmatmul.f32.vlgmr.msra.gmra.mxu2 %v1360_v56  ;;  %v1608_v42 = vld [vmem:[#allocation10 + $0x28] sm:$0xff]  ;;  %v1607_v43 = vld [vmem:[#allocation10 + $0x20] sm:$0xff]  ;;  %v1606_v50 = vld [vmem:[#allocation10 + $0x18] sm:$0xff] }
 0xa34   : > { %1577 = vmatpush.msrb.mxu1 %v1537_v60  ;;  %1558 = vmatpush.msrb.mxu0 %v1553_v61  ;;  %v2016_v45 = vld [vmem:[%s2620_s4 + $0x1] ss:$0 sm:$0xff]  ;;  %v1605_v51 = vld [vmem:[#allocation10 + $0x10] sm:$0xff]  ;;  %v1603_v53 = vld [vmem:[#allocation10] sm:$0xff] }
 0xa35   : > { %1623 = vmatpush.msrb.mxu2 %v1618_v32  ;;  %v1604_v52 = vld [vmem:[#allocation10 + $0x8] sm:$0xff] }
 0xa36   : > { %1578 = vmatpush.msrb.mxu1 %v1536_v62  ;;  %1559 = vmatpush.msrb.mxu0 %v1552_v63  ;;  %v2017_v55 = vld [vmem:[%s2620_s4 + $0x2] ss:$0 sm:$0xff]  ;;  %v2018_v60 = vld [vmem:[%s2622_s6] ss:$0 sm:$0xff] }
 0xa37   : > { %1624 = vmatpush.msrb.mxu2 %v1617_v33 }
 0xa38   : > { %1579 = vmatpush.msrb.mxu1 %v1535_v0  ;;  %1560 = vmatpush.msrb.mxu0 %v1551_v1 }
 0xa39   : > { %1625 = vmatpush.msrb.mxu2 %v1616_v34 }
 0xa3a   : > { %1580 = vmatpush.msrb.mxu1 %v1534_v2  ;;  %1561 = vmatpush.msrb.mxu0 %v1550_v3 }
 0xa3b   : > { %1626 = vmatpush.msrb.mxu2 %v1615_v35 }
 0xa3c   : > { %1581 = vmatpush.msrb.mxu1 %v1533_v4  ;;  %1562 = vmatpush.msrb.mxu0 %v1549_v5 }
 0xa3d   : > { %1627 = vmatpush.msrb.mxu2 %v1614_v36 }
 0xa3e   : > { %1582 = vmatpush.msrb.mxu1 %v1532_v6  ;;  %1563 = vmatpush.msrb.mxu0 %v1548_v7 }
 0xa3f   : > { %1628 = vmatpush.msrb.mxu2 %v1613_v37 }
 0xa40   : > { %1583 = vmatpush.msrb.mxu1 %v1531_v8  ;;  %1564 = vmatpush.msrb.mxu0 %v1547_v9 }
 0xa41   : > { %1629 = vmatpush.msrb.mxu2 %v1612_v38 }
 0xa42   : > { %1584 = vmatpush.msrb.mxu1 %v1530_v10  ;;  %1565 = vmatpush.msrb.mxu0 %v1546_v11 }
 0xa43   : > { %1630 = vmatpush.msrb.mxu2 %v1611_v39 }
 0xa44   : > { %1585 = vmatpush.msrb.mxu1 %v1529_v12  ;;  %1566 = vmatpush.msrb.mxu0 %v1545_v13 }
 0xa45   : > { %1631 = vmatpush.msrb.mxu2 %v1610_v40 }
 0xa46   : > { %1586 = vmatpush.msrb.mxu1 %v1528_v14  ;;  %1567 = vmatpush.msrb.mxu0 %v1544_v15 }
 0xa47   : > { %1632 = vmatpush.msrb.mxu2 %v1609_v41 }
 0xa48   : > { %1587 = vmatpush.msrb.mxu1 %v1527_v16  ;;  %1568 = vmatpush.msrb.mxu0 %v1543_v23 }
 0xa49   : > { %1633 = vmatpush.msrb.mxu2 %v1608_v42 }
 0xa4a   : > { %1588 = vmatpush.msrb.mxu1 %v1526_v24  ;;  %1569 = vmatpush.msrb.mxu0 %v1542_v25 }
 0xa4b   : > { %1634 = vmatpush.msrb.mxu2 %v1607_v43 }
 0xa4c   : > { %1589 = vmatpush.msrb.mxu1 %v1525_v26  ;;  %1570 = vmatpush.msrb.mxu0 %v1541_v27 }
 0xa4d   : > { %1635 = vmatpush.msrb.mxu2 %v1606_v50 }
 0xa4e   : > { %1590 = vmatpush.msrb.mxu1 %v1524_v28  ;;  %1571 = vmatpush.msrb.mxu0 %v1540_v29 }
 0xa4f   : > { %1572 = vmatmul.f32.vlgmr.msrb.gmra.mxu0 %v1362_v31  ;;  %1636 = vmatpush.msrb.mxu2 %v1605_v51 }
 0xa50   : > { %1591 = vmatpush.msrb.mxu1 %v1523_v30 }
 0xa51   : > { %1637 = vmatpush.msrb.mxu2 %v1604_v52 }
 0xa53   : > { %1638 = vmatpush.msrb.mxu2 %v1603_v53 }
 0xaab   : > { %v1412_v18 = vpop.f32.mrf.mxu0 }
 0xaac   : > { %v1432_v19 = vpop.f32.mrf.mxu1 }
 0xaad   : > { %v1433_v20 = vadd.f32 %v1432_v19, %v1412_v18 }
 0xaaf   : > { %v1439_v21 = vadd.f32 %v2015_v17, %v1433_v20 }
 0xab1   : > { %v1440_v22 = vmax.f32 %v1439_v21, 0.0 }
 0xab3   : > { %1511 = vmatmul.f32.vlgmr.msra.gmra.mxu3 %v1440_v22  ;;  %1655 = vst [vmem:[#allocation12] sm:$0xff] %v1440_v22 }
 0xab6   : > { %v1492_v44 = vpop.f32.mrf.mxu2 }
 0xacc   : > { %v1573_v54 = vpop.f32.mrf.mxu0 }
 0xb36   : > { %v1512_v46 = vpop.f32.mrf.mxu3 }
 0xb37   : > { %v1513_v47 = vadd.f32 %v1512_v46, %v1492_v44 }
 0xb39   : > { %v1520_v48 = vadd.f32 %v2016_v45, %v1513_v47 }
 0xb3b   : > { %v1521_v49 = vmax.f32 %v1520_v48, 0.0 }
 0xb3d   : > { %1656 = vst [vmem:[#allocation12 + $0x8] sm:$0xff] %v1521_v49  ;;  %1592 = vmatmul.f32.vlgmr.msrb.gmra.mxu1 %v1521_v49 }
 0xbba   : > { %v1593_v56 = vpop.f32.mrf.mxu1 }
 0xbbb   : > { %v1594_v57 = vadd.f32 %v1593_v56, %v1573_v54 }
 0xbbd   : > { %v1601_v58 = vadd.f32 %v2017_v55, %v1594_v57 }
 0xbbf   : > { %v1602_v59 = vmax.f32 %v1601_v58, 0.0 }
 0xbc1   : > { %1657 = vst [vmem:[#allocation12 + $0x10] sm:$0xff] %v1602_v59  ;;  %1639 = vmatmul.f32.vlgmr.msrb.gmra.mxu2 %v1602_v59 }
 0xc44   : > { %v1640_v61 = vpop.f32.mrf.mxu2 }
 0xc45   : > { %v1641_v62 = vadd.f32 %v2018_v60, %v1640_v61 }
 0xc47   : > { %1643 = vmax.xlane.f32.xlu0 %v1641_v62 }
 0xcba   : > { %v1644_v63 = vpop.xlane.xlu0 %1643 }
 0xcbb   : > { %v1645_v0 = vsub.f32 %v1641_v62, %v1644_v63 }
 0xcbd   : > { %v1646_v1 = vmul.f32 1.442695, %v1645_v0 }
 0xcbf   : > { %2019 = vpow2.f32 %v1646_v1 }
 0xcc5   : > { %v2020_v2 = vpop.eup %2019 }
 0xcc6   : > { %1648 = vadd.xlane.f32.xlu0 %v2020_v2 }
 0xd39   : > { %v1649_v3 = vpop.xlane.xlu0 %1648 }
 0xd3a   : > { %2021 = vlog2.f32 %v1649_v3 }
 0xd40   : > { %v2022_v4 = vpop.eup %2021 }
 0xd41   : > { %v1651_v5 = vmul.f32 0.6931472, %v2022_v4 }
 0xd43   : > { %v1652_v6 = vsub.f32 %v1645_v0, %v1651_v5 }
 0xd45   : > { %1867 = vst [vmem:[%s2503_s3 + $0x18] sm:$0xff] %v1652_v6 }
 0xd46 PF: > { %s1876_s24 = sshll.u32 %s2287_s30, 5  ;;  %s1672_s26 = sshll.u32 %s2503_s3, 4  ;;  %s1673_s26 = int_to_ptr.vmem [resolvable:$true] %s1672_s26 }
 0xd47   : > { %s1671_s25 = scalar_lea.hbm %s2623_s7, %s1876_s24  ;;  %s1659_s13 = scalar_lea.sflag [#allocation4], %s2485_s21 }
 0xd48   : > { %s1674_s2 = sshll.u32 %s1671_s25, 4  ;;  %s2193_s30 = scalar_lea.hbm %s2623_s7, 96  ;;  %s1675_s2 = int_to_ptr.hbm [resolvable:$true] %s1674_s2 }
 0xd49   : > { %s2187_s22 = sshra.s32 %s1675_s2, 4  ;;  %s2188_s22 = int_to_ptr.hbm [resolvable:$true] %s2187_s22 }
 0xd4a   : > { %s2189_s5 = scalar_lea.hbm %s2188_s22, 32  ;;  %p2194_p4 = scmp.lt.s32.totalorder %s2188_s22, %s2623_s7 }
 0xd4b   : > { %p2190_p12 = scmp.ne.s32.totalorder %s2188_s22, %s2189_s5  ;;  %p2195_p6 = scmp.lt.s32.totalorder %s2193_s30, %s2189_s5 }
 0xd4d   : > { %p2191_p13 = pnand %p2190_p12, %p2462_p0  ;;  %p2196_p8 = por %p2195_p6, %p2194_p4 }
 0xd4f   : > { %p2192_p2 = pneg %p2191_p13 }
 0xd51   : > { %p2197_p7 = pnand %p2196_p8, %p2192_p2 }
 0xd53   : > { %2200 = shalt.err (!%p2197_p7)
}
 0xd54   : > { %s2303_s21 = smov 128   ;;  %s2304_s3 = smov 8  }
 0xd55   : > { %1895 = dma.vmem_to_hbm [thread:$0]  (%p2462_p0), %s1673_s26, 512, %s1675_s2, %s1659_s13, %s2303_s21, %s2303_s21, %s2304_s3  }
 0xd56   : > { %s1690_s24 = sshll.u32 %s2624_s8, 4  ;;  %s2305_s16 = smov [#allocation12]   ;;  %s1691_s24 = int_to_ptr.hbm [resolvable:$true] %s1690_s24 }
 0xd57   : > { %s1688_s20 = sshll.u32 %s2305_s16, 4  ;;  %s1689_s20 = int_to_ptr.vmem [resolvable:$true] %s1688_s20 }
 0xd58   : > { %1897 = dma.vmem_to_hbm [thread:$0]  (%p2449_p10), %s1689_s20, 384, %s1691_s24, [#allocation13], %s2303_s21, %s2303_s21, %s2304_s3  }
 0xd59   : > { %2266 = dma.done.wait (%p2449_p10), [#allocation13], 384  }
 0xd5a   : > { %2268 = vsyncadd (%p2449_p10), [#allocation13], 4294966912 }
 0xd5b PF: > { %p1933_p0 = scmp.ge.s32.totalorder %s2295_s10, 2  ;;  %s1710_s25 = sand.u32 1, %s2275_s27  }
 0xd5c   : > { %s1711_s26 = scalar_lea.sflag [#allocation4], %s1710_s25 }
 0xd5d   : > { %p1919_p3 = pnand %p1933_p0, %p2398_p5 }
 0xd5f   : > { %p1920_p1 = pneg %p1919_p3 }
 0xd61   : > { %2270 = dma.done.wait (%p1920_p1), %s1711_s26, 512  }
 0xd62   : > { %2272 = vsyncadd (%p1920_p1), %s1711_s26, 4294966784  ;;  %s28_s10 = sadd.s32 1, %s2295_s10   ;;  %s2651_s17 = sld [smem:[#allocation20_spill]] }
 0xd63   : > { %p25_p9 = scmp.ge.s32.totalorder %s28_s10, 5   ;;  %s2652_s27 = smov %s2279_s28 }
 0xd64   : > { %s2653_s28 = smov %s2283_s29  ;;  %s2654_s29 = smov %s2472_s11 }
 0xd65   : > { %s2655_s30 = smov %s2291_s9  ;;  %27 = sbr.rel (!%p25_p9) target bundleno = 14 (0xe), region = 177 }
 0xd68   : > { %s2656_s9 = smov %s2651_s17 }
 0xd6a   :  { %1717 = vsyncpa [#allocation3], 1 }
 0xd6b   :  { %1719 = vsyncpa [#allocation3 + $0x1], 1 }
 0xd6c   :  { %1720 = vsyncpa [#allocation6], 1 }
 0xd6d   :  { %1721 = vsyncpa [#allocation9], 1 }
 0xd6e   :  { %1722 = vsyncpa [#allocation4], 1 }
 0xd6f   :  { %1724 = vsyncpa [#allocation4 + $0x1], 1 }
 0xd70   :  { %1725 = vsyncpa [#allocation13], 1 }

</bundles_post_ra>
